<compile_context>
chip_gen: v6e
topology: v6e:2x2x1
jax: 0.10.0
libtpu: 0.0.40
codegen_flags: <defaults>
</compile_context>

<pallas_src>
import functools

import jax
import jax.numpy as jnp
from jax.experimental import pallas as pl
from jax.experimental.pallas import tpu as pltpu


_F_IN = 7                   # nn.Linear(7, 1)
_GROUP = 128                # batch rows packed per lane-row (one full lane set)
_LANES = _F_IN * _GROUP     # 896 = 7 * 128: lane dim of the reshaped input
_MAX_TILE_ROWS = 1024       # 131072 batch rows / grid step; keeps double-buffered
                            # VMEM usage (~9 MiB) under the 16 MiB v5e default.


def _round_up(n, m):
    return ((n + m - 1) // m) * m


def _linear_act_kernel(x_ref, s_ref, b_ref, o_ref, *, actv):
    # x_ref: (TBr, 896) VMEM  -- 128 batch rows per sublane-row, fully dense
    # s_ref: (896, 128) VMEM  -- S[c, j] = w[c % 7] if c // 7 == j else 0
    # b_ref: (1,)       SMEM  -- bias scalar
    # o_ref: (TBr, 128) VMEM  -- batch row r*128 + j lands at [r, j] (lane-dense)
    x = x_ref[...].astype(jnp.float32)      # single whole-tile upcast if bf16
    # One MXU matmul does the groups-of-7 weighted reduction and the
    # sublane->lane compaction at once; HIGHEST keeps it f32-exact.
    z = jnp.dot(x, s_ref[...],
                preferred_element_type=jnp.float32,
                precision=jax.lax.Precision.HIGHEST)
    z = z + b_ref[0]                        # bias: one dense VALU add
    if actv == "tanh":
        z = jnp.tanh(z)                     # EUP on a dense (TBr, 128) tile
    elif actv == "sigmoid":
        z = jax.nn.sigmoid(z)
    o_ref[...] = z.astype(o_ref.dtype)


def _choose_tile_rows(num_rows, requested):
    """Rows of the reshaped (R, 896) view processed per grid step."""
    if num_rows <= 8:
        return num_rows                     # single full block (tiny input)
    requested = min(max(requested, 8), _MAX_TILE_ROWS)
    # Multiple of 8 (sublane-dense) and at least 2 grid steps so both v7x
    # TensorCores get work under dimension_semantics=("parallel",).
    cap = _round_up(pl.cdiv(num_rows, 2), 8)
    return (min(requested, cap) // 8) * 8


def nn_predictor_forward(x, weight, bias, *, actv="tanh",
                         tile_rows=_MAX_TILE_ROWS, min_pallas_batch=1024):
    """Forward pass of NNpredictor: act(x @ weight.T + bias).

    Args:
      x:      (B, 7) float array.
      weight: (1, 7) float array (torch nn.Linear.weight layout).
      bias:   (1,)   float array.
      actv:   'tanh' (default), 'sigmoid', or 'no'.
      tile_rows: rows of the (B//128, 896) view per grid step (capped so the
        double-buffered tiles fit the default scoped VMEM on all generations).
      min_pallas_batch: below this batch size the fixed pallas_call cost
        dominates, so use the fused XLA path instead.
    Returns:
      (B, 1) array with the same dtype as x.
    """
    B, f_in = x.shape
    assert f_in == _F_IN and weight.shape == (1, _F_IN) and bias.shape == (1,)

    if B == 0 or B % _GROUP != 0 or B < min_pallas_batch:
        # Zero-copy Pallas is impossible (ragged B) or not worth the fixed cost
        # (tiny B): plain XLA reads x in place and fuses GEMV + activation at
        # ~HBM roofline, so it is the right tool here.
        z = jnp.dot(x.astype(jnp.float32), weight.astype(jnp.float32).T,
                    precision=jax.lax.Precision.HIGHEST) + bias.astype(jnp.float32)
        if actv == "tanh":
            z = jnp.tanh(z)
        elif actv == "sigmoid":
            z = jax.nn.sigmoid(z)
        return z.astype(x.dtype)

    # ---- zero-copy Pallas path ------------------------------------------------
    R = B // _GROUP
    x_r = x.reshape(R, _LANES)          # free bitcast reshape (row-major kept)

    # Weight-selection matrix: folds the 7 weights into the compaction matmul.
    w = weight.astype(jnp.float32).reshape(_F_IN)
    col = jnp.arange(_LANES)
    sel = (col[:, None] // _F_IN) == jnp.arange(_GROUP)[None, :]
    s_mat = jnp.where(sel, w[col % _F_IN][:, None], jnp.float32(0.0))   # (896, 128)
    b_sm = bias.astype(jnp.float32).reshape(1)

    tbr = _choose_tile_rows(R, tile_rows)
    grid = (pl.cdiv(R, tbr),)           # partial last block handled by Pallas

    cost = pl.CostEstimate(
        flops=2 * R * _LANES * _GROUP,
        transcendentals=(R * _GROUP) if actv != "no" else 0,
        bytes_accessed=(R * _LANES + R * _GROUP + _LANES * _GROUP + 1) * 4,
    )

    out = pl.pallas_call(
        functools.partial(_linear_act_kernel, actv=actv),
        out_shape=jax.ShapeDtypeStruct((R, _GROUP), x.dtype),
        grid_spec=pltpu.PrefetchScalarGridSpec(
            num_scalar_prefetch=0,
            grid=grid,
            in_specs=[
                pl.BlockSpec((tbr, _LANES), lambda i: (i, 0)),       # x row tile
                pl.BlockSpec((_LANES, _GROUP), lambda i: (0, 0)),    # S (block
                # index is grid-invariant, so the pipeline keeps it resident)
                pl.BlockSpec(memory_space=pltpu.MemorySpace.SMEM),   # bias
            ],
            out_specs=pl.BlockSpec((tbr, _GROUP), lambda i: (i, 0)),
        ),
        compiler_params=pltpu.CompilerParams(
            dimension_semantics=("parallel",),   # shard row tiles across v7x TCs
        ),
        cost_estimate=cost,
    )(x_r, s_mat, b_sm)

    return out.reshape(B, 1)            # free bitcast reshape back to (B, 1)


if __name__ == "__main__":
    key = jax.random.PRNGKey(0)
    kx, kw, kb = jax.random.split(key, 3)

    # Deterministic params mimicking nn.Linear default init: U(-1/sqrt(7), 1/sqrt(7)).
    bound = 7.0 ** -0.5
    weight = jax.random.uniform(kw, (1, _F_IN), minval=-bound, maxval=bound,
                                dtype=jnp.float32)
    bias = jax.random.uniform(kb, (1,), minval=-bound, maxval=bound,
                              dtype=jnp.float32)

    def reference(xv):
        z = jnp.dot(xv, weight.T, precision=jax.lax.Precision.HIGHEST) + bias
        return jnp.tanh(z)

    # 1) Single-tile Pallas path (B is a multiple of 128).
    B1 = 1024
    x1 = jax.random.normal(kx, (B1, _F_IN), dtype=jnp.float32)
    out1 = jax.block_until_ready(nn_predictor_forward(x1, weight, bias))
    assert out1.shape == (B1, 1)
    assert jnp.allclose(out1, reference(x1), atol=2e-5, rtol=1e-5)

    # 2) Multi-tile grid with a partial (masked) last block: R = 23, tile = 8.
    B2 = 128 * 23
    x2 = jax.random.normal(jax.random.fold_in(kx, 1), (B2, _F_IN), dtype=jnp.float32)
    out2 = jax.block_until_ready(
        nn_predictor_forward(x2, weight, bias, tile_rows=8, min_pallas_batch=0))
    assert out2.shape == (B2, 1)
    assert jnp.allclose(out2, reference(x2), atol=2e-5, rtol=1e-5)

    # 3) Ragged / tiny batch -> fused XLA fallback (zero-copy Pallas impossible).
    B3 = 300
    x3 = jax.random.normal(jax.random.fold_in(kx, 2), (B3, _F_IN), dtype=jnp.float32)
    out3 = jax.block_until_ready(nn_predictor_forward(x3, weight, bias))
    assert out3.shape == (B3, 1)
    assert jnp.allclose(out3, reference(x3), atol=2e-5, rtol=1e-5)

    print("KERNEL_OK")
</pallas_src>

<mosaic_0001>
module attributes {stable_mosaic.version = 11 : i64} {
  func.func @_linear_act_kernel(%arg0: i32, %arg1: memref<8x896xf32, #tpu.memory_space<vmem>>, %arg2: memref<896x128xf32, #tpu.memory_space<vmem>>, %arg3: memref<1xf32, #tpu.memory_space<smem>>, %arg4: memref<8x128xf32, #tpu.memory_space<vmem>>) attributes {dimension_semantics = [#tpu.dimension_semantics<parallel>], iteration_bounds = array<i64: 1>, scalar_prefetch = 0 : i64, scratch_operands = 0 : i64, tpu.core_type = #tpu.core_type<tc>, window_params = [{transform_indices = @transform_0, window_bounds = array<i64: 8, 896>}, {pipeline_mode = #tpu.pipeline_mode<synchronous>, transform_indices = @transform_1, window_bounds = array<i64: 896, 128>}, {transform_indices = @transform_2, window_bounds = array<i64: 1>}, {transform_indices = @transform_3, window_bounds = array<i64: 8, 128>}]} {
    %c0 = arith.constant 0 : index
    %c0_0 = arith.constant 0 : index
    %0 = vector.load %arg1[%c0, %c0_0] : memref<8x896xf32, #tpu.memory_space<vmem>>, vector<8x896xf32>
    %c0_1 = arith.constant 0 : index
    %c0_2 = arith.constant 0 : index
    %1 = vector.load %arg2[%c0_1, %c0_2] : memref<896x128xf32, #tpu.memory_space<vmem>>, vector<896x128xf32>
    %cst = arith.constant dense<0.000000e+00> : vector<8x128xf32>
    %2 = tpu.matmul %0, %1, %cst {dimension_numbers = #tpu.dot_dimension_numbers<[1], [0], [0], [1], [0, 0, 1, 1], [], []>, precision = #tpu.contract_precision<fp32>} : vector<8x896xf32>, vector<896x128xf32>, vector<8x128xf32> -> vector<8x128xf32>
    %c0_3 = arith.constant 0 : index
    %3 = memref.load %arg3[%c0_3] : memref<1xf32, #tpu.memory_space<smem>>
    %4 = vector.broadcast %3 : f32 to vector<8x128xf32>
    %5 = arith.addf %2, %4 : vector<8x128xf32>
    %6 = math.tanh %5 : vector<8x128xf32>
    %c0_4 = arith.constant 0 : index
    %c0_5 = arith.constant 0 : index
    %7 = vector.load %arg4[%c0_4, %c0_5] : memref<8x128xf32, #tpu.memory_space<vmem>>, vector<8x128xf32>
    tpu.vector_store %arg4[%c0_4, %c0_5], %6 {strides = array<i32>} : memref<8x128xf32, #tpu.memory_space<vmem>>, vector<8x128xf32>,
    return
  }
  func.func @transform_0(%arg0: i32) -> (i32, i32) {
    %c0_i32 = arith.constant 0 : i32
    %c0_i32_0 = arith.constant 0 : i32
    return %arg0, %c0_i32 : i32, i32
  }
  func.func @transform_1(%arg0: i32) -> (i32, i32) {
    %c0_i32 = arith.constant 0 : i32
    %c0_i32_0 = arith.constant 0 : i32
    %c0_i32_1 = arith.constant 0 : i32
    return %c0_i32, %c0_i32_0 : i32, i32
  }
  func.func @transform_2(%arg0: i32) -> i32 {
    %c0_i32 = arith.constant 0 : i32
    %c0_i32_0 = arith.constant 0 : i32
    return %c0_i32 : i32
  }
  func.func @transform_3(%arg0: i32) -> (i32, i32) {
    %c0_i32 = arith.constant 0 : i32
    %c0_i32_0 = arith.constant 0 : i32
    return %arg0, %c0_i32 : i32, i32
  }
}

</mosaic_0001>

<bundles_post_ra>
// kernel: tpu_custom_call.1
= control target key start
LH: loop header
LB: loop body
LE: loop exit
PB: predicated region body
PF: predicated region fallthrough
CT: control target
= control target key end

     0   :  { %9 = vsyncpa [#allocation4], 0  ;;  %s6593_s0 = inlined_call_operand.hbm [shape: f32[8,896], index: 0, kind: input, shape index: {}]   ;;  %s6594_s1 = inlined_call_operand.hbm [shape: f32[896,128], index: 1, kind: input, shape index: {}]   ;;  %s6595_s2 = inlined_call_operand.<no memory space> [shape: f32[1], index: 2, kind: input, shape index: {}]   ;;  %s6596_s3 = inlined_call_operand.hbm [shape: f32[8,128], index: 3, kind: output, shape index: {}]  }
   0x1   :  { %10 = vsyncpa [#allocation7], 0 }
   0x2   :  { %11 = vsyncpa [#allocation5], 0  ;;  %s4425_s12 = smov [#allocation3]   ;;  %s4426_s14 = smov [#allocation6]  }
   0x3   :  { %s18_s13 = sshll.u32 %s4425_s12, 4  ;;  %s27_s15 = sshll.u32 %s4426_s14, 4  ;;  %s19_s13 = int_to_ptr.vmem [resolvable:$true] %s18_s13  ;;  %s28_s15 = int_to_ptr.vmem [resolvable:$true] %s27_s15 }
   0x4   :  { %s4367_s16 = scalar_lea.vmem %s19_s13, 896  ;;  %p4372_p1 = scmp.lt.s32.totalorder %s19_s13, %s19_s13 }
   0x5   :  { %p4368_p0 = scmp.ne.s32.totalorder %s19_s13, %s4367_s16  ;;  %p4373_p2 = scmp.lt.s32.totalorder %s4367_s16, %s4367_s16 }
   0x7   :  { %p4374_p3 = por %p4373_p2, %p4372_p1 }
   0x9   :  { %p4375_p4 = pnand %p4374_p3, %p4368_p0 }
   0xb   :  { %4378 = shalt.err (!%p4375_p4)
}
   0xc   :  { %21 = dma.hbm_to_vmem [thread:$0]  %s6593_s0, 896, %s19_s13, [#allocation4]  }
   0xd   :  { %s4387_s19 = scalar_lea.vmem %s28_s15, 14336  ;;  %p4392_p6 = scmp.lt.s32.totalorder %s28_s15, %s28_s15 }
   0xe   :  { %p4388_p5 = scmp.ne.s32.totalorder %s28_s15, %s4387_s19  ;;  %p4393_p7 = scmp.lt.s32.totalorder %s4387_s19, %s4387_s19 }
  0x10   :  { %p4394_p8 = por %p4393_p7, %p4392_p6 }
  0x12   :  { %p4395_p9 = pnand %p4394_p8, %p4388_p5 }
  0x14   :  { %4398 = shalt.err (!%p4395_p9)
}
  0x15   :  { %s4427_s20 = smov 128   ;;  %s4428_s21 = smov 8  }
  0x16   :  { %33 = dma.hbm_to_vmem [thread:$0]  %s6594_s1, 14336, %s28_s15, [#allocation7], %s4427_s20, %s4427_s20, %s4428_s21  }
  0x17   :  { %4419 = dma.done.wait [#allocation4], 896  }
  0x18   :  { %4420 = vsyncadd [#allocation4], 4294966400 }
  0x19   :  { %4421 = dma.done.wait [#allocation7], 14336  }
  0x1a   :  { %4422 = vsyncadd [#allocation7], 4294952960  ;;  %v80_v0 = vld [vmem:[#allocation6 + $0xf8] sm:$0xff]  ;;  %v79_v2 = vld [vmem:[#allocation6 + $0xf0] sm:$0xff]  ;;  %vm4430_vm0 = vmmov 0  }
  0x1b   :  { %v64_v1 = vld [vmem:[#allocation6 + $0x78] sm:$0xff]  ;;  %v4458_v3 = vand.u32 4294901760, %v80_v0  ;;  %v4462_v5 = vand.u32 4294901760, %v79_v2  ;;  %v63_v6 = vld [vmem:[#allocation6 + $0x70] sm:$0xff]  ;;  %v78_v7 = vld [vmem:[#allocation6 + $0xe8] sm:$0xff] }
  0x1c   :  { %v4460_v4 = vand.u32 4294901760, %v64_v1  ;;  %v62_v8 = vld [vmem:[#allocation6 + $0x68] sm:$0xff]  ;;  %v4464_v9 = vand.u32 4294901760, %v63_v6  ;;  %v4466_v10 = vand.u32 4294901760, %v78_v7  ;;  %v77_v12 = vld [vmem:[#allocation6 + $0xe0] sm:$0xff]  ;;  %v76_v14 = vld [vmem:[#allocation6 + $0xd8] sm:$0xff] }
  0x1d   :  { %v4468_v11 = vand.u32 4294901760, %v62_v8  ;;  %v61_v13 = vld [vmem:[#allocation6 + $0x60] sm:$0xff]  ;;  %3408 = vmatprep.subr.mxu0 %v4458_v3  ;;  %v4471_v15 = vand.u32 4294901760, %v77_v12  ;;  %v4475_v17 = vand.u32 4294901760, %v76_v14  ;;  %v4478_v18 = vsub.f32 %v80_v0, %v4458_v3  ;;  %v4480_v19 = vld [vmem:[#allocation6 + $0x58] sm:$0xff]  ;;  %v4482_v20 = vld [vmem:[#allocation6 + $0xd0] sm:$0xff] }
  0x1e   :  { %v4473_v16 = vand.u32 4294901760, %v61_v13  ;;  %v4484_v21 = vld [vmem:[#allocation6 + $0x50] sm:$0xff]  ;;  %3409 = vmatpush3.msra.mxu0 %v4460_v4  ;;  %v4488_v22 = vand.u32 4294901760, %v4480_v19  ;;  %v4491_v23 = vsub.f32 %v64_v1, %v4460_v4  ;;  %v4494_v24 = vand.u32 4294901760, %v4482_v20  ;;  %v4499_v26 = vld [vmem:[#allocation6 + $0xc8] sm:$0xff]  ;;  %v4503_v28 = vld [vmem:[#allocation6 + $0xc0] sm:$0xff] }
  0x1f   :  { %v4497_v25 = vsub.f32 %v79_v2, %v4462_v5  ;;  %v4501_v27 = vld [vmem:[#allocation6 + $0x48] sm:$0xff]  ;;  %3410 = vmatprep.subr.mxu0 %v4462_v5  ;;  %v6610_v29 = vand.u32 4294901760, %v4478_v18  ;;  %v4508_v30 = vand.u32 4294901760, %v4484_v21  ;;  %v4511_v31 = vsub.f32 %v63_v6, %v4464_v9  ;;  %v4525_v37 = vld [vmem:[#allocation6 + $0x40] sm:$0xff]  ;;  %v4549_v46 = vld [vmem:[#allocation6 + $0xb8] sm:$0xff] }
  0x20   :  { %6798 = vst [vmem:[#allocation12_spill] sm:$0xff] %v4494_v24  ;;  %v4514_v32 = vand.u32 4294901760, %v4499_v26  ;;  %3411 = vmatpush3.msra.mxu0 %v4464_v9  ;;  %v6608_v33 = vand.u32 4294901760, %v4491_v23  ;;  %v4520_v35 = vsub.f32 %v78_v7, %v4466_v10  ;;  %v4523_v36 = vand.u32 4294901760, %v4501_v27  ;;  %v4559_v51 = vld [vmem:[#allocation6 + $0x38] sm:$0xff]  ;;  %v4566_v56 = vld [vmem:[#allocation6 + $0xb0] sm:$0xff] }
  0x21   :  { %6799 = vst [vmem:[#allocation13_spill] sm:$0xff] %v4508_v30  ;;  %v6607_v34 = vand.u32 4294901760, %v4497_v25  ;;  %3412 = vmatprep.subr.mxu0 %v4466_v10  ;;  %v391_v38 = vsub.f32 %v4478_v18, %v6610_v29  ;;  %v6605_v39 = vand.u32 4294901760, %v4511_v31  ;;  %v4533_v40 = vsub.f32 %v62_v8, %v4468_v11  ;;  %v4578_v61 = vld [vmem:[#allocation6 + $0x30] sm:$0xff]  ;;  %v4590_v2 = vld [vmem:[#allocation6 + $0xa8] sm:$0xff] }
  0x22   :  { %6800 = vst [vmem:[#allocation14_spill] sm:$0xff] %v4514_v32  ;;  %6801 = vst [vmem:[#allocation15_spill] sm:$0xff] %v4523_v36  ;;  %v4536_v41 = vand.u32 4294901760, %v4503_v28  ;;  %3413 = vmatpush3.msra.mxu0 %v4468_v11  ;;  %v279_v42 = vsub.f32 %v4491_v23, %v6608_v33  ;;  %v6603_v44 = vand.u32 4294901760, %v4520_v35  ;;  %v4547_v45 = vsub.f32 %v77_v12, %v4471_v15 }
  0x23   :  { %v398_v43 = vsub.f32 %v4497_v25, %v6607_v34  ;;  %3414 = vmatprep.subr.mxu0 %v4471_v15  ;;  %v392_v47 = vand.u32 4294901760, %v391_v38  ;;  %v286_v48 = vsub.f32 %v4511_v31, %v6605_v39  ;;  %v6602_v49 = vand.u32 4294901760, %v4533_v40  ;;  %v4681_v39 = vld [vmem:[#allocation6 + $0x90] sm:$0xff] }
  0x24   :  { %6802 = vst [vmem:[#allocation16_spill] sm:$0xff] %v4536_v41  ;;  %v4557_v50 = vand.u32 4294901760, %v4525_v37  ;;  %3415 = vmatpush3.msra.mxu0 %v4473_v16  ;;  %v280_v52 = vand.u32 4294901760, %v279_v42  ;;  %v405_v54 = vsub.f32 %v4520_v35, %v6603_v44  ;;  %v6600_v55 = vand.u32 4294901760, %v4547_v45  ;;  %v4691_v34 = vld [vmem:[#allocation6 + $0x10] sm:$0xff] }
  0x25   :  { %v399_v53 = vand.u32 4294901760, %v398_v43  ;;  %3416 = vmatprep.subr.mxu0 %v4475_v17  ;;  %3443 = vmatprep.subr.mxu1 %v392_v47  ;;  %v287_v57 = vand.u32 4294901760, %v286_v48  ;;  %v293_v58 = vsub.f32 %v4533_v40, %v6602_v49  ;;  %v4573_v59 = vsub.f32 %v61_v13, %v4473_v16  ;;  %v4601_v13 = vld [vmem:[#allocation6 + $0x28] sm:$0xff]  ;;  %v4668_v49 = vld [vmem:[#allocation6 + $0x18] sm:$0xff] }
  0x26   :  { %6803 = vst [vmem:[#allocation17_spill] sm:$0xff] %v4557_v50  ;;  %v4576_v60 = vand.u32 4294901760, %v4549_v46  ;;  %3417 = vmatpush3.msra.mxu0 %v4488_v22  ;;  %3444 = vmatpush3.msra.mxu1 %v280_v52  ;;  %v406_v62 = vand.u32 4294901760, %v405_v54  ;;  %v412_v63 = vsub.f32 %v4547_v45, %v6600_v55  ;;  %v4585_v0 = vsub.f32 %v76_v14, %v4475_v17 }
  0x27   :  { %v4588_v1 = vand.u32 4294901760, %v4559_v51  ;;  %3418 = vmatprep.subr.mxu0 %v4494_v24  ;;  %3445 = vmatprep.subr.mxu1 %v399_v53  ;;  %v294_v6 = vand.u32 4294901760, %v293_v58  ;;  %v6598_v7 = vand.u32 4294901760, %v4573_v59  ;;  %v4596_v8 = vsub.f32 %v4480_v19, %v4488_v22 }
  0x28   :  { %6804 = vst [vmem:[#allocation18_spill] sm:$0xff] %v4576_v60  ;;  %v4599_v12 = vand.u32 4294901760, %v4566_v56  ;;  %3419 = vmatpush3.msra.mxu0 %v4508_v30  ;;  %3446 = vmatpush3.msra.mxu1 %v287_v57  ;;  %v413_v14 = vand.u32 4294901760, %v412_v63  ;;  %v6597_v38 = vand.u32 4294901760, %v4585_v0  ;;  %v4607_v42 = vsub.f32 %v4482_v20, %v4494_v24  ;;  %v4624_v20 = vld [vmem:[#allocation6 + $0xa0] sm:$0xff] }
  0x29   :  { %6805 = vst [vmem:[#allocation19_spill] sm:$0xff] %v4588_v1  ;;  %v4610_v43 = vand.u32 4294901760, %v4578_v61  ;;  %3420 = vmatprep.subr.mxu0 %v4514_v32  ;;  %3447 = vmatprep.subr.mxu1 %v406_v62  ;;  %v300_v19 = vsub.f32 %v4573_v59, %v6598_v7  ;;  %v6599_v47 = vand.u32 4294901760, %v4596_v8  ;;  %v4619_v48 = vsub.f32 %v4484_v21, %v4508_v30 }
  0x2a   :  { %6806 = vst [vmem:[#allocation20_spill] sm:$0xff] %v4599_v12  ;;  %v4622_v52 = vand.u32 4294901760, %v4590_v2  ;;  %3421 = vmatpush3.msra.mxu0 %v4523_v36  ;;  %3448 = vmatpush3.msra.mxu1 %v294_v6  ;;  %v419_v53 = vsub.f32 %v4585_v0, %v6597_v38  ;;  %v6601_v54 = vand.u32 4294901760, %v4607_v42  ;;  %v4633_v57 = vsub.f32 %v4499_v26, %v4514_v32  ;;  %v4647_v38 = vld [vmem:[#allocation6 + $0x20] sm:$0xff] }
  0x2b   :  { %6807 = vst [vmem:[#allocation21_spill] sm:$0xff] %v4610_v43  ;;  %v4636_v21 = vand.u32 4294901760, %v4601_v13  ;;  %3422 = vmatprep.subr.mxu0 %v4536_v41  ;;  %3449 = vmatprep.subr.mxu1 %v413_v14  ;;  %v301_v58 = vand.u32 4294901760, %v300_v19  ;;  %v307_v62 = vsub.f32 %v4596_v8, %v6599_v47  ;;  %v6604_v63 = vand.u32 4294901760, %v4619_v48  ;;  %v4657_v47 = vld [vmem:[#allocation6 + $0x98] sm:$0xff] }
  0x2c   :  { %6808 = vst [vmem:[#allocation22_spill] sm:$0xff] %v4622_v52  ;;  %v4645_v6 = vsub.f32 %v4501_v27, %v4523_v36  ;;  %3423 = vmatpush3.msra.mxu0 %v4557_v50  ;;  %v420_v26 = vand.u32 4294901760, %v419_v53  ;;  %v426_v14 = vsub.f32 %v4607_v42, %v6601_v54  ;;  %v6606_v19 = vand.u32 4294901760, %v4633_v57  ;;  %v43_v36 = vld [vmem:[#allocation3 + $0x8] sm:$0xff] }
  0x2d   :  { %6809 = vst [vmem:[#allocation23_spill] sm:$0xff] %v4636_v21  ;;  %v4655_v7 = vand.u32 4294901760, %v4624_v20  ;;  %3450 = vmatpush3.msra.mxu1 %v301_v58  ;;  %3424 = vmatprep.subr.mxu0 %v4576_v60  ;;  %v308_v27 = vand.u32 4294901760, %v307_v62  ;;  %v314_v55 = vsub.f32 %v4619_v48, %v6604_v63  ;;  %v4666_v54 = vsub.f32 %v4503_v28, %v4536_v41 }
  0x2e   :  { %v6609_v53 = vand.u32 4294901760, %v4645_v6  ;;  %3451 = vmatprep.subr.mxu1 %v420_v26  ;;  %3425 = vmatpush3.msra.mxu0 %v4588_v1  ;;  %v427_v44 = vand.u32 4294901760, %v426_v14  ;;  %v433_v58 = vsub.f32 %v4633_v57, %v6606_v19  ;;  %v4675_v62 = vand.u32 4294901760, %v4647_v38 }
  0x2f   :  { %6810 = vst [vmem:[#allocation24_spill] sm:$0xff] %v4655_v7  ;;  %v4679_v63 = vsub.f32 %v4525_v37, %v4557_v50  ;;  %3452 = vmatpush3.msra.mxu1 %v308_v27  ;;  %3426 = vmatprep.subr.mxu0 %v4599_v12  ;;  %v315_v28 = vand.u32 4294901760, %v314_v55  ;;  %v6613_v14 = vand.u32 4294901760, %v4666_v54  ;;  %v4689_v19 = vand.u32 4294901760, %v4657_v47 }
  0x30   :  { %6811 = vst [vmem:[#allocation25_spill] sm:$0xff] %v4675_v62  ;;  %v321_v26 = vsub.f32 %v4645_v6, %v6609_v53  ;;  %3453 = vmatprep.subr.mxu1 %v427_v44  ;;  %3427 = vmatpush3.msra.mxu0 %v4610_v43  ;;  %v434_v37 = vand.u32 4294901760, %v433_v58  ;;  %v4697_v55 = vsub.f32 %v4549_v46, %v4576_v60  ;;  %v4700_v33 = vand.u32 4294901760, %v4668_v49  ;;  %v4702_v53 = vld [vmem:[#allocation6 + $0x88] sm:$0xff] }
  0x31   :  { %v6616_v27 = vand.u32 4294901760, %v4679_v63  ;;  %3454 = vmatpush3.msra.mxu1 %v315_v28  ;;  %3428 = vmatprep.subr.mxu0 %v4622_v52  ;;  %v440_v44 = vsub.f32 %v4666_v54, %v6613_v14  ;;  %v4710_v58 = vsub.f32 %v4559_v51, %v4588_v1  ;;  %v4713_v46 = vand.u32 4294901760, %v4681_v39  ;;  %v4727_v51 = vld [vmem:[#allocation6 + $0x8] sm:$0xff] }
  0x32   :  { %6812 = vst [vmem:[#allocation26_spill] sm:$0xff] %v4700_v33  ;;  %v322_v29 = vand.u32 4294901760, %v321_v26  ;;  %3455 = vmatprep.subr.mxu1 %v434_v37  ;;  %3429 = vmatpush3.msra.mxu0 %v4636_v21  ;;  %v4722_v60 = vsub.f32 %v4566_v56, %v4599_v12  ;;  %v4725_v14 = vand.u32 4294901760, %v4691_v34  ;;  %v4736_v26 = vand.u32 4294901760, %v4702_v53  ;;  %v4738_v56 = vld [vmem:[#allocation6 + $0x80] sm:$0xff] }
  0x33   :  { %6813 = vst [vmem:[#allocation27_spill] sm:$0xff] %v4713_v46  ;;  %v328_v28 = vsub.f32 %v4679_v63, %v6616_v27  ;;  %3430 = vmatprep.subr.mxu0 %v4655_v7  ;;  %v441_v37 = vand.u32 4294901760, %v440_v44  ;;  %v4733_v27 = vsub.f32 %v4578_v61, %v4610_v43  ;;  %v6816_v50 = vand.u32 4294901760, %v4697_v55  ;;  %v4761_v44 = vld [vmem:[#allocation6] sm:$0xff] }
  0x34   :  { %6814 = vst [vmem:[#allocation28_spill] sm:$0xff] %v4725_v14  ;;  %3456 = vmatpush3.msra.mxu1 %v322_v29  ;;  %6815 = vst [vmem:[#allocation29_spill] sm:$0xff] %v4736_v26  ;;  %3431 = vmatpush3.msra.mxu0 %v4675_v62  ;;  %v4747_v1 = vsub.f32 %v4590_v2, %v4622_v52  ;;  %v6818_v61 = vand.u32 4294901760, %v4710_v58  ;;  %v4769_v41 = vand.u32 4294901760, %v4738_v56  ;;  %v4785_v24 = vand.u32 4294901760, %v4761_v44 }
  0x35   :  { %v329_v12 = vand.u32 4294901760, %v328_v28  ;;  %v447_v29 = vsub.f32 %v4697_v55, %v6816_v50  ;;  %3457 = vmatprep.subr.mxu1 %v441_v37  ;;  %3432 = vmatprep.subr.mxu0 %v4689_v19  ;;  %v4755_v28 = vand.u32 4294901760, %v4727_v51  ;;  %v4759_v50 = vsub.f32 %v4601_v13, %v4636_v21 }
  0x36   :  { %6817 = vst [vmem:[#allocation30_spill] sm:$0xff] %v4747_v1  ;;  %v335_v43 = vsub.f32 %v4710_v58, %v6818_v61  ;;  %3433 = vmatpush3.msra.mxu0 %v4700_v33  ;;  %v6819_v37 = vand.u32 4294901760, %v4722_v60  ;;  %v6820_v13 = vand.u32 4294901760, %v4733_v27  ;;  %v4778_v21 = vsub.f32 %v4624_v20, %v4655_v7 }
  0x37   :  { %3458 = vmatpush3.msra.mxu1 %v329_v12  ;;  %v448_v2 = vand.u32 4294901760, %v447_v29  ;;  %3434 = vmatprep.subr.mxu0 %v4713_v46  ;;  %v6821_v30 = vand.u32 4294901760, %v4747_v1  ;;  %v6822_v20 = vand.u32 4294901760, %v4759_v50  ;;  %v4796_v7 = vand.u32 4294901760, %v43_v36 }
  0x38   :  { %v454_v52 = vsub.f32 %v4722_v60, %v6819_v37  ;;  %v336_v32 = vand.u32 4294901760, %v335_v43  ;;  %v342_v12 = vsub.f32 %v4733_v27, %v6820_v13  ;;  %v42_v37 = vld [vmem:[#allocation3] sm:$0xff]  ;;  %3435 = vmatpush3.msra.mxu0 %v4725_v14  ;;  %v4789_v13 = vsub.f32 %v4647_v38, %v4675_v62 }
  0x39   :  { %3459 = vmatprep.subr.mxu1 %v448_v2  ;;  %v461_v43 = vsub.f32 %v4747_v1, %v6821_v30  ;;  %3436 = vmatprep.subr.mxu0 %v4736_v26  ;;  %v6641_v2 = vand.u32 4294901760, %v4778_v21  ;;  %6823 = vst [vmem:[#allocation31_spill] sm:$0xff] %v4796_v7  ;;  %v4804_v38 = vand.u32 4294901760, %v42_v37 }
  0x3a   :  { %v455_v61 = vand.u32 4294901760, %v454_v52  ;;  %3460 = vmatpush3.msra.mxu1 %v336_v32  ;;  %v343_v29 = vand.u32 4294901760, %v342_v12  ;;  %v349_v52 = vsub.f32 %v4759_v50, %v6822_v20  ;;  %3437 = vmatpush3.msra.mxu0 %v4755_v28  ;;  %v6642_v1 = vand.u32 4294901760, %v4789_v13 }
  0x3b   :  { %v462_v30 = vand.u32 4294901760, %v461_v43  ;;  %v4802_v32 = vsub.f32 %v4657_v47, %v4689_v19  ;;  %6824 = vst [vmem:[#allocation32_spill] sm:$0xff] %v4804_v38  ;;  %3438 = vmatprep.subr.mxu0 %v4769_v41  ;;  %v468_v20 = vsub.f32 %v4778_v21, %v6641_v2  ;;  %v4815_v43 = vsub.f32 %v4668_v49, %v4700_v33 }
  0x3c   :  { %3461 = vmatprep.subr.mxu1 %v455_v61  ;;  %v350_v12 = vand.u32 4294901760, %v349_v52  ;;  %v4811_v61 = vsub.f32 %v43_v36, %v4796_v7  ;;  %3439 = vmatpush3.msra.mxu0 %v4785_v24  ;;  %v356_v47 = vsub.f32 %v4789_v13, %v6642_v1  ;;  %v4823_v52 = vsub.f32 %v42_v37, %v4804_v38 }
  0x3d   :  { %3462 = vmatpush3.msra.mxu1 %v343_v29  ;;  %v4827_v36 = vsub.f32 %v4681_v39, %v4713_v46  ;;  %v469_v2 = vand.u32 4294901760, %v468_v20  ;;  %3478 = vmatprep.subr.mxu0 %v4478_v18  ;;  %v4834_v1 = vsub.f32 %v4691_v34, %v4725_v14  ;;  %v6825_v37 = vand.u32 4294901760, %v4802_v32 }
  0x3e   :  { %3463 = vmatprep.subr.mxu1 %v462_v30  ;;  %v6647_v49 = vand.u32 4294901760, %v4811_v61  ;;  %v6650_v30 = vand.u32 4294901760, %v4815_v43  ;;  %v357_v29 = vand.u32 4294901760, %v356_v47  ;;  %500 = vmatprep.mubr.f32.mxu1 %v4796_v7  ;;  %v4861_v14 = vsub.f32 %v4727_v51, %v4755_v28 }
  0x3f   :  { %3464 = vmatpush3.msra.mxu1 %v350_v12  ;;  %v475_v33 = vsub.f32 %v4802_v32, %v6825_v37  ;;  %v4851_v37 = vsub.f32 %v4702_v53, %v4736_v26  ;;  %v6826_v12 = vand.u32 4294901760, %v4823_v52  ;;  %v6827_v7 = vand.u32 4294901760, %v4827_v36 }
  0x40   :  { %3465 = vmatprep.subr.mxu1 %v469_v2  ;;  %v262_v20 = vsub.f32 %v4811_v61, %v6647_v49  ;;  %v363_v34 = vsub.f32 %v4815_v43, %v6650_v30  ;;  %6828 = vst [vmem:[#allocation33_spill] sm:$0xff] %v4861_v14  ;;  %v6829_v46 = vand.u32 4294901760, %v4834_v1 }
  0x41   :  { %3466 = vmatpush3.msra.mxu1 %v357_v29  ;;  %v476_v39 = vand.u32 4294901760, %v475_v33  ;;  %v268_v2 = vsub.f32 %v4823_v52, %v6826_v12  ;;  %v482_v49 = vsub.f32 %v4827_v36, %v6827_v7  ;;  %v6658_v33 = vand.u32 4294901760, %v4851_v37 }
  0x42   :  { %v263_v30 = vand.u32 4294901760, %v262_v20  ;;  %v364_v47 = vand.u32 4294901760, %v363_v34  ;;  %v370_v53 = vsub.f32 %v4834_v1, %v6829_v46  ;;  %v6657_v12 = vand.u32 4294901760, %v4861_v14 }
  0x43   :  { %3467 = vmatprep.subr.mxu1 %v476_v39  ;;  %v269_v29 = vand.u32 4294901760, %v268_v2  ;;  %v483_v26 = vand.u32 4294901760, %v482_v49  ;;  %v4870_v7 = vsub.f32 %v4738_v56, %v4769_v41  ;;  %v489_v20 = vsub.f32 %v4851_v37, %v6658_v33 }
  0x44   :  { %264 = vmatprep.mubr.f32.mxu0 %v263_v30  ;;  %3468 = vmatpush3.msra.mxu1 %v364_v47  ;;  %v371_v51 = vand.u32 4294901760, %v370_v53  ;;  %v4877_v46 = vsub.f32 %v4761_v44, %v4785_v24  ;;  %v377_v49 = vsub.f32 %v4861_v14, %v6657_v12  ;;  %v6832_v53 = vld [vmem:[#allocation12_spill] sm:$0xff]  ;;  %v6846_v33 = vand.u32 4294901760, %v4478_v18 }
  0x45   :  { %6830 = vst [vmem:[#allocation34_spill] sm:$0xff] %v4870_v7  ;;  %270 = vmatmul.mubr.f32.vlgmr.msra.gmra.mxu0 %v269_v29  ;;  %3469 = vmatprep.subr.mxu1 %v483_v26  ;;  %v6656_v56 = vand.u32 4294901760, %v4870_v7  ;;  %v490_v30 = vand.u32 4294901760, %v489_v20  ;;  %v6833_v29 = vld [vmem:[#allocation13_spill] sm:$0xff]  ;;  %v6835_v20 = vld [vmem:[#allocation14_spill] sm:$0xff]  ;;  %v6845_v12 = vld [vmem:[#allocation24_spill] sm:$0xff] }
  0x46   :  { %6831 = vst [vmem:[#allocation35_spill] sm:$0xff] %v4877_v46  ;;  %3479 = vmatpush3.msra.mxu0 %v4491_v23  ;;  %3470 = vmatpush3.msra.mxu1 %v371_v51  ;;  %v6655_v39 = vand.u32 4294901760, %v4877_v46  ;;  %v378_v34 = vand.u32 4294901760, %v377_v49  ;;  %v6834_v51 = vld [vmem:[#allocation30_spill] sm:$0xff]  ;;  %v6836_v49 = vld [vmem:[#allocation15_spill] sm:$0xff]  ;;  %v6854_v18 = vand.u32 4294901760, %v4520_v35 }
  0x47   :  { %3480 = vmatprep.subr.mxu0 %v4497_v25  ;;  %v496_v44 = vsub.f32 %v4870_v7, %v6656_v56  ;;  %637 = vmatprep.mubr.f32.mxu0 %v4811_v61  ;;  %v6844_v56 = vld [vmem:[#allocation23_spill] sm:$0xff] }
  0x48   :  { %3481 = vmatpush3.msra.mxu0 %v4511_v31  ;;  %3471 = vmatprep.subr.mxu1 %v490_v30  ;;  %v384_v26 = vsub.f32 %v4877_v46, %v6655_v39  ;;  %v6837_v30 = vld [vmem:[#allocation16_spill] sm:$0xff]  ;;  %v6843_v39 = vld [vmem:[#allocation22_spill] sm:$0xff] }
  0x49   :  { %3482 = vmatprep.subr.mxu0 %v4520_v35  ;;  %3472 = vmatpush3.msra.mxu1 %v378_v34  ;;  %v497_v47 = vand.u32 4294901760, %v496_v44  ;;  %v6838_v34 = vld [vmem:[#allocation17_spill] sm:$0xff]  ;;  %v6839_v44 = vld [vmem:[#allocation18_spill] sm:$0xff]  ;;  %v6859_v35 = vand.u32 4294901760, %v4823_v52 }
  0x4a   :  { %3483 = vmatpush3.msra.mxu0 %v4533_v40  ;;  %v385_v2 = vand.u32 4294901760, %v384_v26  ;;  %v6840_v26 = vld [vmem:[#allocation19_spill] sm:$0xff] }
  0x4b   :  { %3473 = vmatprep.subr.mxu1 %v497_v47  ;;  %3484 = vmatprep.subr.mxu0 %v4547_v45  ;;  %v6841_v47 = vld [vmem:[#allocation20_spill] sm:$0xff] }
  0x4c   :  { %3474 = vmatpush3.msra.mxu1 %v385_v2  ;;  %3485 = vmatpush3.msra.mxu0 %v4573_v59  ;;  %v6842_v2 = vld [vmem:[#allocation21_spill] sm:$0xff] }
  0x4d   :  { %502 = vmatmul.mubr.f32.vlgmr.msra.gmra.mxu1 %v4804_v38  ;;  %3486 = vmatprep.subr.mxu0 %v4585_v0  ;;  %v6847_v38 = vld [vmem:[#allocation26_spill] sm:$0xff] }
  0x4e   :  { %3513 = vmatprep.subr.mxu1 %v4458_v3  ;;  %3487 = vmatpush3.msra.mxu0 %v4596_v8 }
  0x4f   :  { %3514 = vmatpush3.msra.mxu1 %v4460_v4  ;;  %3488 = vmatprep.subr.mxu0 %v4607_v42 }
  0x50   :  { %3515 = vmatprep.subr.mxu1 %v4462_v5  ;;  %3489 = vmatpush3.msra.mxu0 %v4619_v48 }
  0x51   :  { %3516 = vmatpush3.msra.mxu1 %v4464_v9  ;;  %3490 = vmatprep.subr.mxu0 %v4633_v57 }
  0x52   :  { %3517 = vmatprep.subr.mxu1 %v4466_v10  ;;  %3491 = vmatpush3.msra.mxu0 %v4645_v6 }
  0x53   :  { %3518 = vmatpush3.msra.mxu1 %v4468_v11  ;;  %3492 = vmatprep.subr.mxu0 %v4666_v54 }
  0x54   :  { %3519 = vmatprep.subr.mxu1 %v4471_v15  ;;  %3493 = vmatpush3.msra.mxu0 %v4679_v63 }
  0x55   :  { %3520 = vmatpush3.msra.mxu1 %v4473_v16  ;;  %3494 = vmatprep.subr.mxu0 %v4697_v55 }
  0x56   :  { %3521 = vmatprep.subr.mxu1 %v4475_v17  ;;  %3495 = vmatpush3.msra.mxu0 %v4710_v58 }
  0x57   :  { %3522 = vmatpush3.msra.mxu1 %v4488_v22  ;;  %3496 = vmatprep.subr.mxu0 %v4722_v60 }
  0x58   :  { %3523 = vmatprep.subr.mxu1 %v6832_v53  ;;  %3497 = vmatpush3.msra.mxu0 %v4733_v27 }
  0x59   :  { %3524 = vmatpush3.msra.mxu1 %v6833_v29  ;;  %3498 = vmatprep.subr.mxu0 %v6834_v51 }
  0x5a   :  { %3525 = vmatprep.subr.mxu1 %v6835_v20  ;;  %3499 = vmatpush3.msra.mxu0 %v4759_v50 }
  0x5b   :  { %3526 = vmatpush3.msra.mxu1 %v6836_v49  ;;  %3500 = vmatprep.subr.mxu0 %v4778_v21 }
  0x5c   :  { %3527 = vmatprep.subr.mxu1 %v6837_v30  ;;  %3501 = vmatpush3.msra.mxu0 %v4789_v13 }
  0x5d   :  { %3528 = vmatpush3.msra.mxu1 %v6838_v34  ;;  %3502 = vmatprep.subr.mxu0 %v4802_v32 }
  0x5e   :  { %3529 = vmatprep.subr.mxu1 %v6839_v44  ;;  %3503 = vmatpush3.msra.mxu0 %v4815_v43 }
  0x5f   :  { %3530 = vmatpush3.msra.mxu1 %v6840_v26  ;;  %3504 = vmatprep.subr.mxu0 %v4827_v36 }
  0x60   :  { %3531 = vmatprep.subr.mxu1 %v6841_v47  ;;  %3505 = vmatpush3.msra.mxu0 %v4834_v1 }
  0x61   :  { %3532 = vmatpush3.msra.mxu1 %v6842_v2  ;;  %3506 = vmatprep.subr.mxu0 %v4851_v37 }
  0x62   :  { %3533 = vmatprep.subr.mxu1 %v6843_v39  ;;  %3507 = vmatpush3.msra.mxu0 %v4861_v14  ;;  %v6848_v14 = vand.u32 4294901760, %v4491_v23  ;;  %v6855_v23 = vand.u32 4294901760, %v4533_v40  ;;  %v6861_v40 = vand.u32 4294901760, %v4596_v8  ;;  %v96_v8 = vld [vmem:[#allocation6 + $0x178] sm:$0xff] }
  0x63   :  { %3534 = vmatpush3.msra.mxu1 %v6844_v56  ;;  %3508 = vmatprep.subr.mxu0 %v4870_v7  ;;  %v6849_v56 = vld [vmem:[#allocation27_spill] sm:$0xff]  ;;  %v6853_v7 = vld [vmem:[#allocation29_spill] sm:$0xff] }
  0x64   :  { %3535 = vmatprep.subr.mxu1 %v6845_v12  ;;  %3509 = vmatpush3.msra.mxu0 %v4877_v46  ;;  %v6850_v12 = vand.u32 4294901760, %v4497_v25  ;;  %v6851_v46 = vld [vmem:[#allocation28_spill] sm:$0xff]  ;;  %v6856_v25 = vand.u32 4294901760, %v4547_v45  ;;  %v6862_v45 = vand.u32 4294901760, %v4607_v42  ;;  %v6866_v42 = vand.u32 4294901760, %v4666_v54 }
  0x65   :  { %3536 = vmatpush3.msra.mxu1 %v4675_v62  ;;  %640 = vmatmul.mubr.f32.vlgmr.msra.gmra.mxu0 %v4823_v52  ;;  %v6852_v62 = vand.u32 4294901760, %v4511_v31  ;;  %v6857_v31 = vand.u32 4294901760, %v4811_v61  ;;  %v94_v54 = vld [vmem:[#allocation6 + $0x168] sm:$0xff] }
  0x66   :  { %3537 = vmatprep.subr.mxu1 %v4689_v19  ;;  %3548 = vmatprep.subr.mxu0 %v6846_v33  ;;  %v5020_v61 = vand.u32 4294901760, %v94_v54  ;;  %v6875_v33 = vand.u32 4294901760, %v4759_v50 }
  0x67   :  { %3538 = vmatpush3.msra.mxu1 %v6847_v38  ;;  %3549 = vmatpush3.msra.mxu0 %v6848_v14  ;;  %v6860_v14 = vand.u32 4294901760, %v4585_v0  ;;  %v6864_v0 = vand.u32 4294901760, %v4633_v57  ;;  %v111_v57 = vld [vmem:[#allocation6 + $0x1f0] sm:$0xff] }
  0x68   :  { %3539 = vmatprep.subr.mxu1 %v6849_v56  ;;  %3550 = vmatprep.subr.mxu0 %v6850_v12  ;;  %6872 = vst [vmem:[#allocation12_spill] sm:$0xff] %v5020_v61  ;;  %v5048_v50 = vsub.f32 %v94_v54, %v5020_v61  ;;  %v6894_v54 = vld [vmem:[#allocation24_spill] sm:$0xff] }
  0x69   :  { %3540 = vmatpush3.msra.mxu1 %v6851_v46  ;;  %3551 = vmatpush3.msra.mxu0 %v6852_v62  ;;  %v6858_v62 = vand.u32 4294901760, %v4573_v59  ;;  %v6863_v59 = vand.u32 4294901760, %v4619_v48 }
  0x6a   :  { %3541 = vmatprep.subr.mxu1 %v6853_v7  ;;  %3552 = vmatprep.subr.mxu0 %v6854_v18  ;;  %v92_v18 = vld [vmem:[#allocation6 + $0x158] sm:$0xff] }
  0x6b   :  { %3542 = vmatpush3.msra.mxu1 %v4755_v28  ;;  %3553 = vmatpush3.msra.mxu0 %v6855_v23 }
  0x6c   :  { %3543 = vmatprep.subr.mxu1 %v4769_v41  ;;  %3554 = vmatprep.subr.mxu0 %v6856_v25  ;;  %v91_v25 = vld [vmem:[#allocation6 + $0x150] sm:$0xff] }
  0x6d   :  { %3544 = vmatpush3.msra.mxu1 %v4785_v24  ;;  %744 = vmatprep.mubr.f32.mxu1 %v6857_v31  ;;  %v6880_v31 = vand.u32 4294901760, %v4815_v43  ;;  %v6885_v43 = vand.u32 4294901760, %v4834_v1 }
  0x6e   :  { %3555 = vmatpush3.msra.mxu0 %v6858_v62  ;;  %748 = vmatmul.mubr.f32.vlgmr.msra.gmra.mxu1 %v6859_v35  ;;  %v107_v35 = vld [vmem:[#allocation6 + $0x1d0] sm:$0xff] }
  0x6f   :  { %3556 = vmatprep.subr.mxu0 %v6860_v14  ;;  %3583 = vmatprep.subr.mxu1 %v4458_v3  ;;  %v6865_v3 = vand.u32 4294901760, %v4645_v6  ;;  %v6869_v6 = vand.u32 4294901760, %v4710_v58  ;;  %v93_v58 = vld [vmem:[#allocation6 + $0x160] sm:$0xff] }
  0x70   :  { %3557 = vmatpush3.msra.mxu0 %v6861_v40  ;;  %3584 = vmatpush3.msra.mxu1 %v4460_v4  ;;  %v112_v4 = vld [vmem:[#allocation6 + $0x1f8] sm:$0xff] }
  0x71   :  { %3558 = vmatprep.subr.mxu0 %v6862_v45  ;;  %3585 = vmatprep.subr.mxu1 %v4462_v5  ;;  %v95_v5 = vld [vmem:[#allocation6 + $0x170] sm:$0xff]  ;;  %v5003_v48 = vand.u32 4294901760, %v112_v4  ;;  %v5075_v45 = vand.u32 4294901760, %v92_v18 }
  0x72   :  { %3559 = vmatpush3.msra.mxu0 %v6863_v59  ;;  %3586 = vmatpush3.msra.mxu1 %v4464_v9  ;;  %v6867_v9 = vand.u32 4294901760, %v4679_v63  ;;  %v110_v63 = vld [vmem:[#allocation6 + $0x1e8] sm:$0xff]  ;;  %v5081_v59 = vand.u32 4294901760, %v91_v25 }
  0x73   :  { %3560 = vmatprep.subr.mxu0 %v6864_v0  ;;  %3587 = vmatprep.subr.mxu1 %v4466_v10  ;;  %v6868_v10 = vand.u32 4294901760, %v4697_v55  ;;  %v5018_v55 = vand.u32 4294901760, %v111_v57  ;;  %v5028_v52 = vand.u32 4294901760, %v110_v63  ;;  %6884 = vst [vmem:[#allocation16_spill] sm:$0xff] %v5075_v45  ;;  %v6665_v0 = vand.u32 4294901760, %v5048_v50 }
  0x74   :  { %3561 = vmatpush3.msra.mxu0 %v6865_v3  ;;  %3588 = vmatpush3.msra.mxu1 %v4468_v11  ;;  %v5005_v11 = vand.u32 4294901760, %v96_v8  ;;  %6886 = vst [vmem:[#allocation17_spill] sm:$0xff] %v5081_v59 }
  0x75   :  { %3562 = vmatprep.subr.mxu0 %v6866_v42  ;;  %3589 = vmatprep.subr.mxu1 %v4471_v15  ;;  %v5010_v15 = vand.u32 4294901760, %v95_v5  ;;  %6874 = vst [vmem:[#allocation13_spill] sm:$0xff] %v5028_v52  ;;  %v5051_v23 = vsub.f32 %v111_v57, %v5018_v55  ;;  %v6889_v42 = vld [vmem:[#allocation33_spill] sm:$0xff] }
  0x76   :  { %3563 = vmatpush3.msra.mxu0 %v6867_v9  ;;  %3590 = vmatpush3.msra.mxu1 %v4473_v16  ;;  %v6870_v16 = vand.u32 4294901760, %v4722_v60  ;;  %v5026_v60 = vsub.f32 %v96_v8, %v5005_v11 }
  0x77   :  { %3564 = vmatprep.subr.mxu0 %v6868_v10  ;;  %3591 = vmatprep.subr.mxu1 %v4475_v17  ;;  %v6871_v17 = vand.u32 4294901760, %v4733_v27  ;;  %v5031_v27 = vsub.f32 %v112_v4, %v5003_v48  ;;  %v5037_v12 = vsub.f32 %v95_v5, %v5010_v15  ;;  %v106_v4 = vld [vmem:[#allocation6 + $0x1c8] sm:$0xff]  ;;  %v6891_v5 = vld [vmem:[#allocation23_spill] sm:$0xff]  ;;  %v6892_v10 = vld [vmem:[#allocation34_spill] sm:$0xff] }
  0x78   :  { %3565 = vmatpush3.msra.mxu0 %v6869_v6  ;;  %3592 = vmatpush3.msra.mxu1 %v4488_v22  ;;  %v6873_v22 = vand.u32 4294901760, %v6834_v51  ;;  %v5042_v51 = vand.u32 4294901760, %v93_v58  ;;  %v6893_v57 = vand.u32 4294901760, %v6892_v10  ;;  %v5115_v6 = vsub.f32 %v92_v18, %v5075_v45 }
  0x79   :  { %3566 = vmatprep.subr.mxu0 %v6870_v16  ;;  %3593 = vmatprep.subr.mxu1 %v6832_v53  ;;  %v6876_v53 = vand.u32 4294901760, %v4778_v21  ;;  %v6879_v21 = vand.u32 4294901760, %v4802_v32  ;;  %v6667_v32 = vand.u32 4294901760, %v5037_v12  ;;  %v105_v16 = vld [vmem:[#allocation6 + $0x1c0] sm:$0xff]  ;;  %v5132_v18 = vsub.f32 %v91_v25, %v5081_v59 }
  0x7a   :  { %3567 = vmatpush3.msra.mxu0 %v6871_v17  ;;  %3594 = vmatpush3.msra.mxu1 %v6833_v29  ;;  %v109_v29 = vld [vmem:[#allocation6 + $0x1e0] sm:$0xff]  ;;  %6877 = vst [vmem:[#allocation30_spill] sm:$0xff] %v5042_v51  ;;  %v5071_v14 = vsub.f32 %v93_v58, %v5042_v51 }
  0x7b   :  { %3568 = vmatprep.subr.mxu0 %v6873_v22  ;;  %3595 = vmatprep.subr.mxu1 %v6835_v20  ;;  %v6878_v20 = vand.u32 4294901760, %v4789_v13  ;;  %v6670_v13 = vand.u32 4294901760, %v5026_v60  ;;  %v5064_v62 = vand.u32 4294901760, %v109_v29  ;;  %v89_v17 = vld [vmem:[#allocation6 + $0x140] sm:$0xff] }
  0x7c   :  { %3569 = vmatpush3.msra.mxu0 %v6875_v33  ;;  %3596 = vmatpush3.msra.mxu1 %v6836_v49  ;;  %v108_v49 = vld [vmem:[#allocation6 + $0x1d8] sm:$0xff]  ;;  %v6668_v58 = vand.u32 4294901760, %v5071_v14  ;;  %v6896_v33 = vld [vmem:[#allocation35_spill] sm:$0xff] }
  0x7d   :  { %3570 = vmatprep.subr.mxu0 %v6876_v53  ;;  %3597 = vmatprep.subr.mxu1 %v6837_v30  ;;  %v6671_v30 = vand.u32 4294901760, %v5031_v27  ;;  %6881 = vst [vmem:[#allocation14_spill] sm:$0xff] %v5064_v62  ;;  %v5073_v40 = vand.u32 4294901760, %v108_v49  ;;  %v5095_v1 = vsub.f32 %v5026_v60, %v6670_v13  ;;  %v5109_v9 = vsub.f32 %v109_v29, %v5064_v62  ;;  %v6898_v29 = vld [vmem:[#allocation31_spill] sm:$0xff] }
  0x7e   :  { %3571 = vmatpush3.msra.mxu0 %v6878_v20  ;;  %3598 = vmatpush3.msra.mxu1 %v6838_v34  ;;  %v5059_v34 = vsub.f32 %v110_v63, %v5028_v52  ;;  %v6897_v53 = vand.u32 4294901760, %v6896_v33  ;;  %v88_v33 = vld [vmem:[#allocation6 + $0x138] sm:$0xff] }
  0x7f   :  { %3572 = vmatprep.subr.mxu0 %v6879_v21  ;;  %3599 = vmatprep.subr.mxu1 %v6839_v44  ;;  %v6882_v44 = vand.u32 4294901760, %v4827_v36  ;;  %6883 = vst [vmem:[#allocation15_spill] sm:$0xff] %v5073_v40  ;;  %v90_v36 = vld [vmem:[#allocation6 + $0x148] sm:$0xff]  ;;  %v5090_v3 = vsub.f32 %v5031_v27, %v6671_v30  ;;  %v5121_v22 = vsub.f32 %v108_v49, %v5073_v40  ;;  %v5134_v21 = vand.u32 4294901760, %v106_v4 }
  0x80   :  { %3573 = vmatpush3.msra.mxu0 %v6880_v31  ;;  %3600 = vmatpush3.msra.mxu1 %v6840_v26  ;;  %v6669_v26 = vand.u32 4294901760, %v5051_v23  ;;  %v6666_v8 = vand.u32 4294901760, %v5059_v34  ;;  %v5117_v63 = vand.u32 4294901760, %v90_v36  ;;  %v5139_v49 = vsub.f32 %v5048_v50, %v6665_v0  ;;  %v6900_v31 = vld [vmem:[#allocation25_spill] sm:$0xff]  ;;  %v86_v30 = vld [vmem:[#allocation6 + $0x128] sm:$0xff] }
  0x81   :  { %3574 = vmatprep.subr.mxu0 %v6882_v44  ;;  %3601 = vmatprep.subr.mxu1 %v6841_v47  ;;  %v6887_v47 = vand.u32 4294901760, %v4851_v37  ;;  %v6890_v37 = vand.u32 4294901760, %v6889_v42  ;;  %6899 = vst [vmem:[#allocation20_spill] sm:$0xff] %v5134_v21  ;;  %v6901_v44 = vld [vmem:[#allocation32_spill] sm:$0xff]  ;;  %v6672_v10 = vand.u32 4294901760, %v5109_v9  ;;  %v87_v0 = vld [vmem:[#allocation6 + $0x130] sm:$0xff] }
  0x82   :  { %3575 = vmatpush3.msra.mxu0 %v6885_v43  ;;  %3602 = vmatpush3.msra.mxu1 %v6842_v2  ;;  %v5097_v2 = vand.u32 4294901760, %v107_v35  ;;  %6895 = vst [vmem:[#allocation19_spill] sm:$0xff] %v5117_v63  ;;  %v5129_v20 = vsub.f32 %v5051_v23, %v6669_v26  ;;  %v5148_v25 = vsub.f32 %v5059_v34, %v6666_v8  ;;  %v5188_v13 = vand.u32 4294901760, %v88_v33  ;;  %v101_v43 = vld [vmem:[#allocation6 + $0x1a0] sm:$0xff] }
  0x83   :  { %3576 = vmatprep.subr.mxu0 %v6887_v47  ;;  %3603 = vmatprep.subr.mxu1 %v6843_v39  ;;  %v5106_v39 = vsub.f32 %v5037_v12, %v6667_v32  ;;  %v6675_v32 = vand.u32 4294901760, %v5132_v18  ;;  %v5201_v8 = vand.u32 4294901760, %v87_v0  ;;  %v5230_v47 = vand.u32 4294901760, %v86_v30 }
  0x84   :  { %6888 = vst [vmem:[#allocation18_spill] sm:$0xff] %v5097_v2  ;;  %3577 = vmatpush3.msra.mxu0 %v6890_v37  ;;  %3604 = vmatpush3.msra.mxu1 %v6891_v5  ;;  %v5151_v42 = vsub.f32 %v107_v35, %v5097_v2  ;;  %v5156_v5 = vand.u32 4294901760, %v105_v16  ;;  %v5164_v35 = vsub.f32 %v90_v36, %v5117_v63  ;;  %v5177_v36 = vld [vmem:[#allocation6 + $0x1b0] sm:$0xff]  ;;  %6906 = vst [vmem:[#allocation28_spill] sm:$0xff] %v5188_v13  ;;  %v85_v37 = vld [vmem:[#allocation6 + $0x120] sm:$0xff] }
  0x85   :  { %3578 = vmatprep.subr.mxu0 %v6893_v57  ;;  %3605 = vmatprep.subr.mxu1 %v6894_v54  ;;  %v5159_v57 = vand.u32 4294901760, %v89_v17  ;;  %v104_v54 = vld [vmem:[#allocation6 + $0x1b8] sm:$0xff]  ;;  %6908 = vst [vmem:[#allocation33_spill] sm:$0xff] %v5201_v8  ;;  %6911 = vst [vmem:[#allocation24_spill] sm:$0xff] %v5230_v47 }
  0x86   :  { %3579 = vmatpush3.msra.mxu0 %v6897_v53  ;;  %914 = vmatprep.mubr.f32.mxu0 %v6898_v29  ;;  %6902 = vst [vmem:[#allocation21_spill] sm:$0xff] %v5156_v5  ;;  %6904 = vst [vmem:[#allocation26_spill] sm:$0xff] %v5164_v35  ;;  %v6673_v53 = vand.u32 4294901760, %v5121_v22  ;;  %v5204_v26 = vsub.f32 %v105_v16, %v5156_v5  ;;  %v5220_v16 = vand.u32 4294901760, %v5177_v36 }
  0x87   :  { %3606 = vmatpush3.msra.mxu1 %v6900_v31  ;;  %916 = vmatmul.mubr.f32.vlgmr.msra.gmra.mxu0 %v6901_v44  ;;  %6903 = vst [vmem:[#allocation22_spill] sm:$0xff] %v5159_v57  ;;  %v6674_v31 = vand.u32 4294901760, %v5115_v6 }
  0x88   :  { %3607 = vmatprep.subr.mxu1 %v4689_v19  ;;  %3618 = vmatprep.subr.mxu0 %v5003_v48  ;;  %v5169_v19 = vsub.f32 %v5071_v14, %v6668_v58  ;;  %v5181_v58 = vsub.f32 %v106_v4, %v5134_v21  ;;  %v5196_v4 = vsub.f32 %v5109_v9, %v6672_v10 }
  0x89   :  { %3608 = vmatpush3.msra.mxu1 %v6847_v38  ;;  %3619 = vmatpush3.msra.mxu0 %v5005_v11  ;;  %v1261_v38 = vand.u32 4294901760, %v5129_v20  ;;  %v6678_v20 = vand.u32 4294901760, %v5151_v42  ;;  %6909 = vst [vmem:[#allocation23_spill] sm:$0xff] %v5204_v26  ;;  %v5212_v10 = vsub.f32 %v5121_v22, %v6673_v53  ;;  %6910 = vst [vmem:[#allocation34_spill] sm:$0xff] %v5220_v16 }
  0x8a   :  { %3609 = vmatprep.subr.mxu1 %v6849_v56  ;;  %3620 = vmatprep.subr.mxu0 %v5018_v55  ;;  %v5186_v56 = vand.u32 4294901760, %v104_v54 }
  0x8b   :  { %3610 = vmatpush3.msra.mxu1 %v6851_v46  ;;  %3621 = vmatpush3.msra.mxu0 %v5010_v15  ;;  %v5199_v46 = vsub.f32 %v89_v17, %v5159_v57  ;;  %v5217_v17 = vsub.f32 %v5115_v6, %v6674_v31 }
  0x8c   :  { %6905 = vst [vmem:[#allocation27_spill] sm:$0xff] %v5186_v56  ;;  %3611 = vmatprep.subr.mxu1 %v6853_v7  ;;  %3622 = vmatprep.subr.mxu0 %v5028_v52  ;;  %v102_v7 = vld [vmem:[#allocation6 + $0x1a8] sm:$0xff]  ;;  %v5246_v53 = vsub.f32 %v104_v54, %v5186_v56  ;;  %v1282_v54 = vand.u32 4294901760, %v5212_v10  ;;  %v5275_v10 = vsub.f32 %v86_v30, %v5230_v47  ;;  %v83_v52 = vld [vmem:[#allocation6 + $0x110] sm:$0xff] }
  0x8d   :  { %6907 = vst [vmem:[#allocation29_spill] sm:$0xff] %v5199_v46  ;;  %3612 = vmatpush3.msra.mxu1 %v4755_v28  ;;  %3623 = vmatpush3.msra.mxu0 %v5020_v61  ;;  %v5227_v28 = vsub.f32 %v5132_v18, %v6675_v32  ;;  %v5241_v32 = vsub.f32 %v5151_v42, %v6678_v20  ;;  %v6914_v20 = vand.u32 4294901760, %v5090_v3  ;;  %v5261_v61 = vand.u32 4294901760, %v102_v7 }
  0x8e   :  { %3613 = vmatprep.subr.mxu1 %v4769_v41  ;;  %3624 = vmatprep.subr.mxu0 %v5064_v62  ;;  %v5236_v41 = vsub.f32 %v88_v33, %v5188_v13  ;;  %v5243_v62 = vand.u32 4294901760, %v85_v37  ;;  %6913 = vst [vmem:[#allocation31_spill] sm:$0xff] %v5246_v53  ;;  %v6916_v33 = vand.u32 4294901760, %v5095_v1  ;;  %v6917_v3 = vand.u32 4294901760, %v5181_v58 }
  0x8f   :  { %3614 = vmatpush3.msra.mxu1 %v4785_v24  ;;  %1018 = vmatprep.mubr.f32.mxu1 %v6898_v29  ;;  %v1275_v24 = vand.u32 4294901760, %v5196_v4  ;;  %v5252_v29 = vsub.f32 %v87_v0, %v5201_v8  ;;  %6915 = vst [vmem:[#allocation25_spill] sm:$0xff] %v5261_v61  ;;  %v84_v4 = vld [vmem:[#allocation6 + $0x118] sm:$0xff]  ;;  %v45_v0 = vld [vmem:[#allocation3 + $0x18] sm:$0xff]  ;;  %v1289_v1 = vand.u32 4294901760, %v5241_v32  ;;  %v5290_v30 = vsub.f32 %v5177_v36, %v5220_v16 }
  0x90   :  { %6912 = vst [vmem:[#allocation35_spill] sm:$0xff] %v5243_v62  ;;  %3625 = vmatpush3.msra.mxu0 %v5042_v51  ;;  %1020 = vmatmul.mubr.f32.vlgmr.msra.gmra.mxu1 %v6901_v44  ;;  %v1170_v51 = vand.u32 4294901760, %v5217_v17  ;;  %v5263_v44 = vand.u32 4294901760, %v101_v43  ;;  %v6918_v17 = vand.u32 4294901760, %v5164_v35  ;;  %v6922_v32 = vand.u32 4294901760, %v5199_v46 }
  0x91   :  { %3626 = vmatprep.subr.mxu0 %v5073_v40  ;;  %3653 = vmatprep.subr.mxu1 %v6914_v20  ;;  %v5272_v20 = vsub.f32 %v5181_v58, %v6917_v3  ;;  %v100_v3 = vld [vmem:[#allocation6 + $0x198] sm:$0xff]  ;;  %v5305_v31 = vand.u32 4294901760, %v84_v4  ;;  %v5307_v36 = vand.u32 4294901760, %v45_v0 }
  0x92   :  { %3627 = vmatpush3.msra.mxu0 %v5075_v45  ;;  %3654 = vmatpush3.msra.mxu1 %v6916_v33  ;;  %v5280_v40 = vsub.f32 %v5164_v35, %v6918_v17  ;;  %v44_v45 = vld [vmem:[#allocation3 + $0x10] sm:$0xff]  ;;  %v5285_v33 = vsub.f32 %v85_v37, %v5243_v62  ;;  %v6920_v17 = vand.u32 4294901760, %v5106_v39  ;;  %v5303_v37 = vsub.f32 %v5199_v46, %v6922_v32  ;;  %v99_v35 = vld [vmem:[#allocation6 + $0x190] sm:$0xff] }
  0x93   :  { %3628 = vmatprep.subr.mxu0 %v5097_v2  ;;  %3655 = vmatprep.subr.mxu1 %v1261_v38  ;;  %v6921_v2 = vand.u32 4294901760, %v5204_v26  ;;  %6923 = vst [vmem:[#allocation36_spill] sm:$0xff] %v5307_v36  ;;  %v6924_v39 = vand.u32 4294901760, %v5148_v25  ;;  %v6926_v32 = vand.u32 4294901760, %v5139_v49  ;;  %v1296_v46 = vand.u32 4294901760, %v5272_v20 }
  0x94   :  { %6919 = vst [vmem:[#allocation32_spill] sm:$0xff] %v5285_v33  ;;  %3629 = vmatpush3.msra.mxu0 %v5081_v59  ;;  %3656 = vmatpush3.msra.mxu1 %v6920_v17  ;;  %v5313_v59 = vand.u32 4294901760, %v83_v52  ;;  %v5325_v25 = vand.u32 4294901760, %v100_v3  ;;  %v5338_v20 = vsub.f32 %v101_v43, %v5263_v44  ;;  %v6930_v43 = vand.u32 4294901760, %v5236_v41 }
  0x95   :  { %v5298_v38 = vsub.f32 %v5204_v26, %v6921_v2  ;;  %3630 = vmatprep.subr.mxu0 %v5134_v21  ;;  %3657 = vmatprep.subr.mxu1 %v6924_v39  ;;  %v5316_v2 = vsub.f32 %v102_v7, %v5261_v61  ;;  %v5318_v26 = vand.u32 4294901760, %v44_v45  ;;  %v1184_v21 = vand.u32 4294901760, %v5280_v40 }
  0x96   :  { %3631 = vmatpush3.msra.mxu0 %v5117_v63  ;;  %3658 = vmatpush3.msra.mxu1 %v6926_v32  ;;  %v6927_v7 = vand.u32 4294901760, %v5246_v53  ;;  %v5334_v63 = vand.u32 4294901760, %v99_v35  ;;  %v98_v32 = vld [vmem:[#allocation6 + $0x188] sm:$0xff]  ;;  %v6929_v40 = vand.u32 4294901760, %v5169_v19  ;;  %v1191_v39 = vand.u32 4294901760, %v5303_v37  ;;  %v97_v37 = vld [vmem:[#allocation6 + $0x180] sm:$0xff] }
  0x97   :  { %6925 = vst [vmem:[#allocation37_spill] sm:$0xff] %v5318_v26  ;;  %3632 = vmatprep.subr.mxu0 %v5156_v5  ;;  %3659 = vmatprep.subr.mxu1 %v1275_v24  ;;  %v1303_v24 = vand.u32 4294901760, %v5298_v38  ;;  %v82_v5 = vld [vmem:[#allocation6 + $0x108] sm:$0xff]  ;;  %v1197_v49 = vsub.f32 %v5236_v41, %v6930_v43  ;;  %v5356_v19 = vsub.f32 %v83_v52, %v5313_v59  ;;  %v6932_v38 = vand.u32 4294901760, %v5290_v30 }
  0x98   :  { %v5332_v17 = vsub.f32 %v5246_v53, %v6927_v7  ;;  %6928 = vst [vmem:[#allocation38_spill] sm:$0xff] %v5334_v63  ;;  %3633 = vmatpush3.msra.mxu0 %v5159_v57  ;;  %3660 = vmatpush3.msra.mxu1 %v6929_v40  ;;  %v5346_v7 = vsub.f32 %v84_v4, %v5305_v31  ;;  %v81_v40 = vld [vmem:[#allocation6 + $0x100] sm:$0xff]  ;;  %v6933_v43 = vand.u32 4294901760, %v5227_v28  ;;  %v6719_v28 = vand.u32 4294901760, %v5285_v33 }
  0x99   :  { %v5349_v53 = vsub.f32 %v45_v0, %v5307_v36  ;;  %3634 = vmatprep.subr.mxu0 %v5186_v56  ;;  %3661 = vmatprep.subr.mxu1 %v1282_v54  ;;  %v5360_v4 = vsub.f32 %v44_v45, %v5318_v26  ;;  %v6931_v0 = vand.u32 4294901760, %v5252_v29  ;;  %v5366_v56 = vand.u32 4294901760, %v98_v32 }
  0x9a   :  { %3635 = vmatpush3.msra.mxu0 %v5188_v13  ;;  %3662 = vmatpush3.msra.mxu1 %v1170_v51  ;;  %v5370_v52 = vsub.f32 %v100_v3, %v5325_v25  ;;  %v1310_v45 = vand.u32 4294901760, %v5332_v17  ;;  %v1316_v51 = vsub.f32 %v5290_v30, %v6932_v38  ;;  %v5377_v13 = vand.u32 4294901760, %v82_v5 }
  0x9b   :  { %v1204_v54 = vsub.f32 %v5252_v29, %v6931_v0  ;;  %3636 = vmatprep.subr.mxu0 %v5220_v16  ;;  %3663 = vmatprep.subr.mxu1 %v1289_v1  ;;  %v5383_v3 = vand.u32 4294901760, %v97_v37  ;;  %v5385_v57 = vand.u32 4294901760, %v81_v40  ;;  %v5389_v17 = vsub.f32 %v99_v35, %v5334_v63 }
  0x9c   :  { %3637 = vmatpush3.msra.mxu0 %v5201_v8  ;;  %3664 = vmatpush3.msra.mxu1 %v6933_v43  ;;  %v1198_v38 = vand.u32 4294901760, %v1197_v49  ;;  %v6934_v0 = vand.u32 4294901760, %v5316_v2  ;;  %v6935_v1 = vand.u32 4294901760, %v5275_v10  ;;  %v1317_v49 = vand.u32 4294901760, %v1316_v51 }
  0x9d   :  { %3638 = vmatprep.subr.mxu0 %v5261_v61  ;;  %3665 = vmatprep.subr.mxu1 %v1296_v46  ;;  %v1205_v16 = vand.u32 4294901760, %v1204_v54  ;;  %v5403_v46 = vsub.f32 %v98_v32, %v5366_v56  ;;  %v6936_v43 = vand.u32 4294901760, %v5338_v20  ;;  %v6938_v32 = vand.u32 4294901760, %v5349_v53 }
  0x9e   :  { %v1323_v8 = vsub.f32 %v5316_v2, %v6934_v0  ;;  %3639 = vmatpush3.msra.mxu0 %v5230_v47  ;;  %3666 = vmatpush3.msra.mxu1 %v1184_v21  ;;  %v1211_v35 = vsub.f32 %v5275_v10, %v6935_v1  ;;  %v5407_v0 = vsub.f32 %v82_v5, %v5377_v13 }
  0x9f   :  { %3640 = vmatprep.subr.mxu0 %v5263_v44  ;;  %3667 = vmatprep.subr.mxu1 %v1303_v24  ;;  %v1330_v21 = vsub.f32 %v5338_v20, %v6936_v43  ;;  %v5415_v1 = vsub.f32 %v81_v40, %v5385_v57  ;;  %v1124_v24 = vsub.f32 %v5349_v53, %v6938_v32  ;;  %v6940_v40 = vand.u32 4294901760, %v5360_v4 }
  0xa0   :  { %3641 = vmatpush3.msra.mxu0 %v5243_v62  ;;  %3668 = vmatpush3.msra.mxu1 %v1191_v39  ;;  %v5422_v5 = vsub.f32 %v97_v37, %v5383_v3  ;;  %v1324_v43 = vand.u32 4294901760, %v1323_v8  ;;  %v1218_v39 = vsub.f32 %v5285_v33, %v6719_v28  ;;  %v1212_v32 = vand.u32 4294901760, %v1211_v35 }
  0xa1   :  { %6937 = vst [vmem:[#allocation39_spill] sm:$0xff] %v5415_v1  ;;  %3642 = vmatprep.subr.mxu0 %v5325_v25  ;;  %3669 = vmatprep.subr.mxu1 %v1310_v45  ;;  %v1130_v54 = vsub.f32 %v5360_v4, %v6940_v40  ;;  %v6941_v37 = vand.u32 4294901760, %v5370_v52  ;;  %v1331_v45 = vand.u32 4294901760, %v1330_v21  ;;  %v6942_v28 = vand.u32 4294901760, %v5346_v7 }
  0xa2   :  { %6939 = vst [vmem:[#allocation40_spill] sm:$0xff] %v5422_v5  ;;  %3643 = vmatpush3.msra.mxu0 %v5305_v31  ;;  %3670 = vmatpush3.msra.mxu1 %v1198_v38  ;;  %v1125_v38 = vand.u32 4294901760, %v1124_v24  ;;  %v6943_v35 = vand.u32 4294901760, %v5389_v17  ;;  %v6723_v8 = vand.u32 4294901760, %v5422_v5  ;;  %v6722_v61 = vand.u32 4294901760, %v5415_v1 }
  0xa3   :  { %v1337_v51 = vsub.f32 %v5370_v52, %v6941_v37  ;;  %3644 = vmatprep.subr.mxu0 %v5334_v63  ;;  %3671 = vmatprep.subr.mxu1 %v1317_v49  ;;  %v1225_v40 = vsub.f32 %v5346_v7, %v6942_v28  ;;  %v1219_v49 = vand.u32 4294901760, %v1218_v39  ;;  %v1131_v21 = vand.u32 4294901760, %v1130_v54 }
  0xa4   :  { %3645 = vmatpush3.msra.mxu0 %v5313_v59  ;;  %3672 = vmatpush3.msra.mxu1 %v1205_v16  ;;  %v1344_v37 = vsub.f32 %v5389_v17, %v6943_v35  ;;  %v6944_v63 = vand.u32 4294901760, %v5356_v19  ;;  %v6945_v24 = vand.u32 4294901760, %v5403_v46  ;;  %v6946_v54 = vand.u32 4294901760, %v5407_v0 }
  0xa5   :  { %3646 = vmatprep.subr.mxu0 %v5366_v56  ;;  %3673 = vmatprep.subr.mxu1 %v1324_v43  ;;  %v1338_v16 = vand.u32 4294901760, %v1337_v51  ;;  %v1226_v43 = vand.u32 4294901760, %v1225_v40  ;;  %v1358_v51 = vsub.f32 %v5422_v5, %v6723_v8  ;;  %v6964_v8 = vld [vmem:[#allocation28_spill] sm:$0xff] }
  0xa6   :  { %v1232_v28 = vsub.f32 %v5356_v19, %v6944_v63  ;;  %3647 = vmatpush3.msra.mxu0 %v5377_v13  ;;  %3674 = vmatpush3.msra.mxu1 %v1212_v32  ;;  %v1351_v35 = vsub.f32 %v5403_v46, %v6945_v24  ;;  %v1239_v39 = vsub.f32 %v5407_v0, %v6946_v54  ;;  %v1345_v63 = vand.u32 4294901760, %v1344_v37  ;;  %v6950_v24 = vld [vmem:[#allocation23_spill] sm:$0xff]  ;;  %v6953_v54 = vld [vmem:[#allocation30_spill] sm:$0xff] }
  0xa7   :  { %3648 = vmatprep.subr.mxu0 %v5383_v3  ;;  %3675 = vmatprep.subr.mxu1 %v1331_v45  ;;  %v1246_v45 = vsub.f32 %v5415_v1, %v6722_v61  ;;  %v1359_v37 = vand.u32 4294901760, %v1358_v51  ;;  %v6956_v51 = vld [vmem:[#allocation16_spill] sm:$0xff]  ;;  %v6963_v61 = vld [vmem:[#allocation27_spill] sm:$0xff] }
  0xa8   :  { %3649 = vmatpush3.msra.mxu0 %v5385_v57  ;;  %1126 = vmatprep.mubr.f32.mxu0 %v1125_v38  ;;  %v1233_v32 = vand.u32 4294901760, %v1232_v28  ;;  %v1352_v40 = vand.u32 4294901760, %v1351_v35  ;;  %v1240_v38 = vand.u32 4294901760, %v1239_v39  ;;  %v6948_v28 = vld [vmem:[#allocation26_spill] sm:$0xff]  ;;  %v6954_v39 = vld [vmem:[#allocation31_spill] sm:$0xff] }
  0xa9   :  { %3676 = vmatpush3.msra.mxu1 %v1219_v49  ;;  %1132 = vmatmul.mubr.f32.vlgmr.msra.gmra.mxu0 %v1131_v21  ;;  %v1247_v49 = vand.u32 4294901760, %v1246_v45  ;;  %v6947_v21 = vld [vmem:[#allocation13_spill] sm:$0xff]  ;;  %v6951_v35 = vld [vmem:[#allocation14_spill] sm:$0xff] }
  0xaa   :  { %3677 = vmatprep.subr.mxu1 %v1338_v16  ;;  %3688 = vmatprep.subr.mxu0 %v5031_v27  ;;  %v6949_v16 = vld [vmem:[#allocation12_spill] sm:$0xff]  ;;  %v6958_v45 = vld [vmem:[#allocation17_spill] sm:$0xff] }
  0xab   :  { %3678 = vmatpush3.msra.mxu1 %v1226_v43  ;;  %3689 = vmatpush3.msra.mxu0 %v5026_v60  ;;  %v6952_v43 = vld [vmem:[#allocation29_spill] sm:$0xff] }
  0xac   :  { %3679 = vmatprep.subr.mxu1 %v1345_v63  ;;  %3690 = vmatprep.subr.mxu0 %v5051_v23  ;;  %v6955_v63 = vld [vmem:[#allocation15_spill] sm:$0xff] }
  0xad   :  { %3680 = vmatpush3.msra.mxu1 %v1233_v32  ;;  %3691 = vmatpush3.msra.mxu0 %v5037_v12  ;;  %v6957_v32 = vld [vmem:[#allocation18_spill] sm:$0xff] }
  0xae   :  { %3681 = vmatprep.subr.mxu1 %v1352_v40  ;;  %3692 = vmatprep.subr.mxu0 %v5059_v34  ;;  %v6959_v40 = vld [vmem:[#allocation20_spill] sm:$0xff] }
  0xaf   :  { %3682 = vmatpush3.msra.mxu1 %v1240_v38  ;;  %3693 = vmatpush3.msra.mxu0 %v5048_v50  ;;  %v6960_v38 = vld [vmem:[#allocation19_spill] sm:$0xff] }
  0xb0   :  { %3683 = vmatprep.subr.mxu1 %v1359_v37  ;;  %3694 = vmatprep.subr.mxu0 %v5109_v9  ;;  %v6961_v37 = vld [vmem:[#allocation21_spill] sm:$0xff] }
  0xb1   :  { %3684 = vmatpush3.msra.mxu1 %v1247_v49  ;;  %1362 = vmatprep.mubr.f32.mxu1 %v5307_v36  ;;  %v6962_v49 = vld [vmem:[#allocation22_spill] sm:$0xff]  ;;  %v6966_v36 = vld [vmem:[#allocation33_spill] sm:$0xff] }
  0xb2   :  { %3695 = vmatpush3.msra.mxu0 %v5071_v14  ;;  %1364 = vmatmul.mubr.f32.vlgmr.msra.gmra.mxu1 %v5318_v26  ;;  %v6965_v26 = vld [vmem:[#allocation34_spill] sm:$0xff] }
  0xb3   :  { %3696 = vmatprep.subr.mxu0 %v5121_v22  ;;  %3723 = vmatprep.subr.mxu1 %v5003_v48 }
  0xb4   :  { %3697 = vmatpush3.msra.mxu0 %v5115_v6  ;;  %3724 = vmatpush3.msra.mxu1 %v5005_v11 }
  0xb5   :  { %3698 = vmatprep.subr.mxu0 %v5151_v42  ;;  %3725 = vmatprep.subr.mxu1 %v5018_v55 }
  0xb6   :  { %3699 = vmatpush3.msra.mxu0 %v5132_v18  ;;  %3726 = vmatpush3.msra.mxu1 %v5010_v15 }
  0xb7   :  { %3700 = vmatprep.subr.mxu0 %v5181_v58  ;;  %3727 = vmatprep.subr.mxu1 %v6947_v21 }
  0xb8   :  { %3701 = vmatpush3.msra.mxu0 %v6948_v28  ;;  %3728 = vmatpush3.msra.mxu1 %v6949_v16 }
  0xb9   :  { %3702 = vmatprep.subr.mxu0 %v6950_v24  ;;  %3729 = vmatprep.subr.mxu1 %v6951_v35 }
  0xba   :  { %3703 = vmatpush3.msra.mxu0 %v6952_v43  ;;  %3730 = vmatpush3.msra.mxu1 %v6953_v54 }
  0xbb   :  { %3704 = vmatprep.subr.mxu0 %v6954_v39  ;;  %3731 = vmatprep.subr.mxu1 %v6955_v63 }
  0xbc   :  { %3705 = vmatpush3.msra.mxu0 %v5236_v41  ;;  %3732 = vmatpush3.msra.mxu1 %v6956_v51 }
  0xbd   :  { %3706 = vmatprep.subr.mxu0 %v5290_v30  ;;  %3733 = vmatprep.subr.mxu1 %v6957_v32 }
  0xbe   :  { %3707 = vmatpush3.msra.mxu0 %v5252_v29  ;;  %3734 = vmatpush3.msra.mxu1 %v6958_v45 }
  0xbf   :  { %3708 = vmatprep.subr.mxu0 %v5316_v2  ;;  %3735 = vmatprep.subr.mxu1 %v6959_v40 }
  0xc0   :  { %3709 = vmatpush3.msra.mxu0 %v5275_v10  ;;  %3736 = vmatpush3.msra.mxu1 %v6960_v38 }
  0xc1   :  { %3710 = vmatprep.subr.mxu0 %v5338_v20  ;;  %3737 = vmatprep.subr.mxu1 %v6961_v37 }
  0xc2   :  { %3711 = vmatpush3.msra.mxu0 %v5285_v33  ;;  %3738 = vmatpush3.msra.mxu1 %v6962_v49  ;;  %v6967_v33 = vld [vmem:[#allocation25_spill] sm:$0xff] }
  0xc3   :  { %3712 = vmatprep.subr.mxu0 %v5370_v52  ;;  %3739 = vmatprep.subr.mxu1 %v6963_v61 }
  0xc4   :  { %3713 = vmatpush3.msra.mxu0 %v5346_v7  ;;  %3740 = vmatpush3.msra.mxu1 %v6964_v8 }
  0xc5   :  { %3714 = vmatprep.subr.mxu0 %v5389_v17  ;;  %3741 = vmatprep.subr.mxu1 %v6965_v26 }
  0xc6   :  { %3715 = vmatpush3.msra.mxu0 %v5356_v19  ;;  %3742 = vmatpush3.msra.mxu1 %v6966_v36 }
  0xc7   :  { %3716 = vmatprep.subr.mxu0 %v5403_v46  ;;  %3743 = vmatprep.subr.mxu1 %v6967_v33  ;;  %v6968_v33 = vand.u32 4294901760, %v5031_v27  ;;  %v6973_v27 = vand.u32 4294901760, %v5059_v34  ;;  %v6978_v34 = vand.u32 4294901760, %v5360_v4 }
  0xc8   :  { %3717 = vmatpush3.msra.mxu0 %v5407_v0  ;;  %3744 = vmatpush3.msra.mxu1 %v5230_v47  ;;  %v6969_v47 = vand.u32 4294901760, %v5026_v60  ;;  %v6974_v60 = vand.u32 4294901760, %v5048_v50  ;;  %v6980_v50 = vand.u32 4294901760, %v5115_v6  ;;  %v6984_v6 = vand.u32 4294901760, %v6948_v28 }
  0xc9   :  { %3718 = vmatprep.subr.mxu0 %v5422_v5  ;;  %3745 = vmatprep.subr.mxu1 %v5263_v44  ;;  %v6970_v5 = vld [vmem:[#allocation38_spill] sm:$0xff] }
  0xca   :  { %3719 = vmatpush3.msra.mxu0 %v5415_v1  ;;  %1499 = vmatprep.mubr.f32.mxu0 %v5349_v53  ;;  %v6971_v1 = vand.u32 4294901760, %v5051_v23  ;;  %v6975_v23 = vand.u32 4294901760, %v5109_v9  ;;  %v6981_v9 = vand.u32 4294901760, %v5151_v42  ;;  %v6987_v42 = vand.u32 4294901760, %v6954_v39 }
  0xcb   :  { %3746 = vmatpush3.msra.mxu1 %v5243_v62  ;;  %1502 = vmatmul.mubr.f32.vlgmr.msra.gmra.mxu0 %v5360_v4  ;;  %v6972_v62 = vand.u32 4294901760, %v5037_v12  ;;  %v6976_v12 = vand.u32 4294901760, %v5349_v53  ;;  %v143_v53 = vld [vmem:[#allocation6 + $0x2f0] sm:$0xff]  ;;  %v6993_v39 = vand.u32 4294901760, %v5275_v10  ;;  %v124_v10 = vld [vmem:[#allocation6 + $0x258] sm:$0xff] }
  0xcc   :  { %3747 = vmatprep.subr.mxu1 %v5325_v25  ;;  %3758 = vmatprep.subr.mxu0 %v6968_v33  ;;  %v6988_v33 = vand.u32 4294901760, %v5236_v41 }
  0xcd   :  { %3748 = vmatpush3.msra.mxu1 %v5305_v31  ;;  %3759 = vmatpush3.msra.mxu0 %v6969_v47  ;;  %v6979_v47 = vand.u32 4294901760, %v5121_v22  ;;  %v6983_v22 = vand.u32 4294901760, %v5181_v58  ;;  %v127_v58 = vld [vmem:[#allocation6 + $0x270] sm:$0xff] }
  0xce   :  { %3749 = vmatprep.subr.mxu1 %v6970_v5  ;;  %3760 = vmatprep.subr.mxu0 %v6971_v1  ;;  %v142_v1 = vld [vmem:[#allocation6 + $0x2e8] sm:$0xff]  ;;  %v5592_v28 = vand.u32 4294901760, %v127_v58 }
  0xcf   :  { %3750 = vmatpush3.msra.mxu1 %v5313_v59  ;;  %3761 = vmatpush3.msra.mxu0 %v6972_v62  ;;  %v6977_v62 = vand.u32 4294901760, %v5071_v14  ;;  %v6982_v14 = vand.u32 4294901760, %v5132_v18  ;;  %v6986_v18 = vand.u32 4294901760, %v6952_v43  ;;  %v125_v43 = vld [vmem:[#allocation6 + $0x260] sm:$0xff] }
  0xd0   :  { %3751 = vmatprep.subr.mxu1 %v5366_v56  ;;  %3762 = vmatprep.subr.mxu0 %v6973_v27 }
  0xd1   :  { %3752 = vmatpush3.msra.mxu1 %v5377_v13  ;;  %3763 = vmatpush3.msra.mxu0 %v6974_v60 }
  0xd2   :  { %3753 = vmatprep.subr.mxu1 %v5383_v3  ;;  %3764 = vmatprep.subr.mxu0 %v6975_v23 }
  0xd3   :  { %3754 = vmatpush3.msra.mxu1 %v5385_v57  ;;  %1606 = vmatprep.mubr.f32.mxu1 %v6976_v12 }
  0xd4   :  { %3765 = vmatpush3.msra.mxu0 %v6977_v62  ;;  %1610 = vmatmul.mubr.f32.vlgmr.msra.gmra.mxu1 %v6978_v34  ;;  %v7001_v62 = vand.u32 4294901760, %v5346_v7 }
  0xd5   :  { %3766 = vmatprep.subr.mxu0 %v6979_v47  ;;  %3793 = vmatprep.subr.mxu1 %v5003_v48  ;;  %v128_v48 = vld [vmem:[#allocation6 + $0x278] sm:$0xff]  ;;  %v5645_v47 = vand.u32 4294901760, %v124_v10 }
  0xd6   :  { %3767 = vmatpush3.msra.mxu0 %v6980_v50  ;;  %3794 = vmatpush3.msra.mxu1 %v5005_v11  ;;  %v6985_v11 = vand.u32 4294901760, %v6950_v24  ;;  %v6990_v24 = vand.u32 4294901760, %v5252_v29  ;;  %v123_v50 = vld [vmem:[#allocation6 + $0x250] sm:$0xff] }
  0xd7   :  { %3768 = vmatprep.subr.mxu0 %v6981_v9  ;;  %3795 = vmatprep.subr.mxu1 %v5018_v55  ;;  %v144_v55 = vld [vmem:[#allocation6 + $0x2f8] sm:$0xff]  ;;  %7002 = vst [vmem:[#allocation14_spill] sm:$0xff] %v5645_v47 }
  0xd8   :  { %3769 = vmatpush3.msra.mxu0 %v6982_v14  ;;  %3796 = vmatpush3.msra.mxu1 %v5010_v15  ;;  %v5579_v15 = vand.u32 4294901760, %v128_v48  ;;  %v5587_v4 = vand.u32 4294901760, %v144_v55  ;;  %v7005_v14 = vand.u32 4294901760, %v5356_v19  ;;  %v138_v19 = vld [vmem:[#allocation6 + $0x2c8] sm:$0xff] }
  0xd9   :  { %3770 = vmatprep.subr.mxu0 %v6983_v22  ;;  %3797 = vmatprep.subr.mxu1 %v6947_v21  ;;  %v6989_v21 = vand.u32 4294901760, %v5290_v30  ;;  %v5605_v30 = vand.u32 4294901760, %v142_v1 }
  0xda   :  { %3771 = vmatpush3.msra.mxu0 %v6984_v6  ;;  %3798 = vmatpush3.msra.mxu1 %v6949_v16  ;;  %v126_v16 = vld [vmem:[#allocation6 + $0x268] sm:$0xff]  ;;  %v5598_v41 = vsub.f32 %v128_v48, %v5579_v15  ;;  %v7006_v48 = vand.u32 4294901760, %v5403_v46  ;;  %v7007_v6 = vld [vmem:[#allocation25_spill] sm:$0xff] }
  0xdb   :  { %3772 = vmatprep.subr.mxu0 %v6985_v11  ;;  %3799 = vmatprep.subr.mxu1 %v6951_v35  ;;  %v5600_v35 = vand.u32 4294901760, %v143_v53  ;;  %6992 = vst [vmem:[#allocation13_spill] sm:$0xff] %v5605_v30  ;;  %v5610_v29 = vand.u32 4294901760, %v126_v16  ;;  %v5636_v12 = vsub.f32 %v142_v1, %v5605_v30 }
  0xdc   :  { %3773 = vmatpush3.msra.mxu0 %v6986_v18  ;;  %3800 = vmatpush3.msra.mxu1 %v6953_v54  ;;  %v6991_v54 = vand.u32 4294901760, %v5316_v2  ;;  %v5619_v2 = vsub.f32 %v127_v58, %v5592_v28  ;;  %v6739_v60 = vand.u32 4294901760, %v5598_v41  ;;  %v121_v58 = vld [vmem:[#allocation6 + $0x240] sm:$0xff] }
  0xdd   :  { %3774 = vmatprep.subr.mxu0 %v6987_v42  ;;  %3801 = vmatprep.subr.mxu1 %v6955_v63  ;;  %6994 = vst [vmem:[#allocation26_spill] sm:$0xff] %v5610_v29  ;;  %v141_v63 = vld [vmem:[#allocation6 + $0x2e0] sm:$0xff]  ;;  %v5628_v23 = vsub.f32 %v143_v53, %v5600_v35  ;;  %v7010_v42 = vand.u32 4294901760, %v5407_v0  ;;  %v7011_v53 = vld [vmem:[#allocation24_spill] sm:$0xff] }
  0xde   :  { %3775 = vmatpush3.msra.mxu0 %v6988_v33  ;;  %3802 = vmatpush3.msra.mxu1 %v6956_v51  ;;  %v5613_v51 = vsub.f32 %v144_v55, %v5587_v4  ;;  %v5662_v22 = vsub.f32 %v5598_v41, %v6739_v60  ;;  %v5670_v55 = vand.u32 4294901760, %v123_v50  ;;  %v5685_v33 = vsub.f32 %v124_v10, %v5645_v47  ;;  %v7017_v10 = vld [vmem:[#allocation36_spill] sm:$0xff] }
  0xdf   :  { %3776 = vmatprep.subr.mxu0 %v6989_v21  ;;  %3803 = vmatprep.subr.mxu1 %v6957_v32  ;;  %v6995_v32 = vand.u32 4294901760, %v5338_v20  ;;  %v6999_v20 = vand.u32 4294901760, %v5370_v52  ;;  %v139_v52 = vld [vmem:[#allocation6 + $0x2d0] sm:$0xff]  ;;  %v7012_v21 = vld [vmem:[#allocation40_spill] sm:$0xff] }
  0xe0   :  { %3777 = vmatpush3.msra.mxu0 %v6990_v24  ;;  %3804 = vmatpush3.msra.mxu1 %v6958_v45  ;;  %v5621_v45 = vand.u32 4294901760, %v125_v43  ;;  %v6740_v34 = vand.u32 4294901760, %v5613_v51  ;;  %v5668_v11 = vand.u32 4294901760, %v139_v52  ;;  %7009 = vst [vmem:[#allocation31_spill] sm:$0xff] %v5670_v55 }
  0xe1   :  { %3778 = vmatprep.subr.mxu0 %v6991_v54  ;;  %3805 = vmatprep.subr.mxu1 %v6959_v40  ;;  %v6997_v40 = vld [vmem:[#allocation32_spill] sm:$0xff] }
  0xe2   :  { %3779 = vmatpush3.msra.mxu0 %v6993_v39  ;;  %3806 = vmatpush3.msra.mxu1 %v6960_v38  ;;  %6996 = vst [vmem:[#allocation12_spill] sm:$0xff] %v5621_v45  ;;  %v6998_v27 = vand.u32 4294901760, %v6997_v40  ;;  %v140_v38 = vld [vmem:[#allocation6 + $0x2d8] sm:$0xff]  ;;  %v5651_v9 = vsub.f32 %v125_v43, %v5621_v45  ;;  %7008 = vst [vmem:[#allocation30_spill] sm:$0xff] %v5668_v11  ;;  %v5682_v46 = vsub.f32 %v5613_v51, %v6740_v34  ;;  %v137_v43 = vld [vmem:[#allocation6 + $0x2c0] sm:$0xff] }
  0xe3   :  { %3780 = vmatprep.subr.mxu0 %v6995_v32  ;;  %3807 = vmatprep.subr.mxu1 %v6961_v37  ;;  %v5633_v37 = vand.u32 4294901760, %v141_v63  ;;  %v5653_v7 = vand.u32 4294901760, %v140_v38 }
  0xe4   :  { %3781 = vmatpush3.msra.mxu0 %v6998_v27  ;;  %3808 = vmatpush3.msra.mxu1 %v6962_v49  ;;  %v5642_v49 = vsub.f32 %v126_v16, %v5610_v29  ;;  %v7013_v16 = vand.u32 4294901760, %v7012_v21  ;;  %v6735_v54 = vand.u32 4294901760, %v5651_v9  ;;  %v5711_v27 = vand.u32 4294901760, %v138_v19 }
  0xe5   :  { %3782 = vmatprep.subr.mxu0 %v6999_v20  ;;  %3809 = vmatprep.subr.mxu1 %v6963_v61  ;;  %7000 = vst [vmem:[#allocation23_spill] sm:$0xff] %v5633_v37  ;;  %v7003_v61 = vand.u32 4294901760, %v5389_v17  ;;  %7004 = vst [vmem:[#allocation29_spill] sm:$0xff] %v5653_v7  ;;  %v6737_v17 = vand.u32 4294901760, %v5628_v23  ;;  %v5674_v18 = vsub.f32 %v141_v63, %v5633_v37  ;;  %v7015_v63 = vld [vmem:[#allocation39_spill] sm:$0xff]  ;;  %v5713_v20 = vand.u32 4294901760, %v121_v58 }
  0xe6   :  { %3783 = vmatpush3.msra.mxu0 %v7001_v62  ;;  %3810 = vmatpush3.msra.mxu1 %v6964_v8  ;;  %v6736_v8 = vand.u32 4294901760, %v5619_v2  ;;  %v6733_v1 = vand.u32 4294901760, %v5642_v49  ;;  %v5700_v39 = vsub.f32 %v140_v38, %v5653_v7  ;;  %v7016_v32 = vand.u32 4294901760, %v7015_v63  ;;  %7018 = vst [vmem:[#allocation16_spill] sm:$0xff] %v5711_v27  ;;  %v7020_v62 = vld [vmem:[#allocation35_spill] sm:$0xff]  ;;  %v7021_v38 = vld [vmem:[#allocation37_spill] sm:$0xff] }
  0xe7   :  { %3784 = vmatprep.subr.mxu0 %v7003_v61  ;;  %3811 = vmatprep.subr.mxu1 %v6965_v26  ;;  %v122_v26 = vld [vmem:[#allocation6 + $0x248] sm:$0xff]  ;;  %v5709_v40 = vsub.f32 %v5628_v23, %v6737_v17  ;;  %7019 = vst [vmem:[#allocation18_spill] sm:$0xff] %v5713_v20  ;;  %v5718_v61 = vsub.f32 %v123_v50, %v5670_v55  ;;  %v5737_v21 = vand.u32 4294901760, %v137_v43  ;;  %v136_v63 = vld [vmem:[#allocation6 + $0x2b8] sm:$0xff] }
  0xe8   :  { %3785 = vmatpush3.msra.mxu0 %v7005_v14  ;;  %3812 = vmatpush3.msra.mxu1 %v6966_v36  ;;  %v6734_v36 = vand.u32 4294901760, %v5636_v12  ;;  %v5694_v0 = vsub.f32 %v5619_v2, %v6736_v8  ;;  %v5696_v24 = vand.u32 4294901760, %v122_v26  ;;  %v5735_v50 = vsub.f32 %v5642_v49, %v6733_v1 }
  0xe9   :  { %3786 = vmatprep.subr.mxu0 %v7006_v48  ;;  %3813 = vmatprep.subr.mxu1 %v7007_v6  ;;  %v6738_v48 = vand.u32 4294901760, %v5674_v18  ;;  %v120_v6 = vld [vmem:[#allocation6 + $0x238] sm:$0xff]  ;;  %7022 = vst [vmem:[#allocation17_spill] sm:$0xff] %v5737_v21  ;;  %v6744_v8 = vand.u32 4294901760, %v5718_v61  ;;  %v5784_v60 = vsub.f32 %v137_v43, %v5737_v21 }
  0xea   :  { %3787 = vmatpush3.msra.mxu0 %v7010_v42  ;;  %3814 = vmatpush3.msra.mxu1 %v7011_v53  ;;  %7014 = vst [vmem:[#allocation15_spill] sm:$0xff] %v5696_v24  ;;  %v5723_v14 = vsub.f32 %v5636_v12, %v6734_v36  ;;  %v5727_v42 = vsub.f32 %v139_v52, %v5668_v11  ;;  %v2116_v53 = vand.u32 4294901760, %v5682_v46  ;;  %v5758_v1 = vand.u32 4294901760, %v120_v6  ;;  %v117_v52 = vld [vmem:[#allocation6 + $0x220] sm:$0xff] }
  0xeb   :  { %3788 = vmatprep.subr.mxu0 %v7013_v16  ;;  %3815 = vmatprep.subr.mxu1 %v5263_v44  ;;  %v6741_v16 = vand.u32 4294901760, %v5685_v33  ;;  %v5749_v46 = vsub.f32 %v5651_v9, %v6735_v54  ;;  %v5761_v36 = vsub.f32 %v138_v19, %v5711_v27  ;;  %v5776_v19 = vand.u32 4294901760, %v136_v63  ;;  %7027 = vst [vmem:[#allocation27_spill] sm:$0xff] %v5784_v60  ;;  %v134_v54 = vld [vmem:[#allocation6 + $0x2a8] sm:$0xff] }
  0xec   :  { %3789 = vmatpush3.msra.mxu0 %v7016_v32  ;;  %1776 = vmatprep.mubr.f32.mxu0 %v7017_v10  ;;  %v6742_v32 = vand.u32 4294901760, %v5700_v39  ;;  %7025 = vst [vmem:[#allocation21_spill] sm:$0xff] %v5758_v1 }
  0xed   :  { %3816 = vmatpush3.msra.mxu1 %v7020_v62  ;;  %1778 = vmatmul.mubr.f32.vlgmr.msra.gmra.mxu0 %v7021_v38  ;;  %v5756_v62 = vsub.f32 %v121_v58, %v5713_v20  ;;  %v6743_v58 = vand.u32 4294901760, %v5727_v42  ;;  %7026 = vst [vmem:[#allocation22_spill] sm:$0xff] %v5776_v19  ;;  %v5781_v17 = vsub.f32 %v5685_v33, %v6741_v16 }
  0xee   :  { %3817 = vmatprep.subr.mxu1 %v5325_v25  ;;  %3828 = vmatprep.subr.mxu0 %v5587_v4  ;;  %v5744_v25 = vsub.f32 %v122_v26, %v5696_v24  ;;  %v119_v26 = vld [vmem:[#allocation6 + $0x230] sm:$0xff]  ;;  %v5792_v34 = vsub.f32 %v5700_v39, %v6742_v32 }
  0xef   :  { %3818 = vmatpush3.msra.mxu1 %v5305_v31  ;;  %3829 = vmatpush3.msra.mxu0 %v5579_v15  ;;  %v2123_v31 = vand.u32 4294901760, %v5709_v40  ;;  %7024 = vst [vmem:[#allocation19_spill] sm:$0xff] %v5756_v62  ;;  %v135_v40 = vld [vmem:[#allocation6 + $0x2b0] sm:$0xff] }
  0xf0   :  { %7023 = vst [vmem:[#allocation20_spill] sm:$0xff] %v5744_v25  ;;  %3819 = vmatprep.subr.mxu1 %v6970_v5  ;;  %3830 = vmatprep.subr.mxu0 %v5600_v35  ;;  %v5769_v5 = vsub.f32 %v5674_v18, %v6738_v48  ;;  %v118_v48 = vld [vmem:[#allocation6 + $0x228] sm:$0xff]  ;;  %v5802_v43 = vand.u32 4294901760, %v135_v40 }
  0xf1   :  { %3820 = vmatpush3.msra.mxu1 %v5313_v59  ;;  %3831 = vmatpush3.msra.mxu0 %v5592_v28  ;;  %v5794_v59 = vand.u32 4294901760, %v119_v26  ;;  %v5819_v16 = vand.u32 4294901760, %v118_v48 }
  0xf2   :  { %3821 = vmatprep.subr.mxu1 %v5366_v56  ;;  %3832 = vmatprep.subr.mxu0 %v5605_v30  ;;  %v2137_v44 = vand.u32 4294901760, %v5769_v5  ;;  %v133_v56 = vld [vmem:[#allocation6 + $0x2a0] sm:$0xff]  ;;  %v47_v5 = vld [vmem:[#allocation3 + $0x28] sm:$0xff]  ;;  %v5865_v30 = vsub.f32 %v135_v40, %v5802_v43  ;;  %v7041_v40 = vand.u32 4294901760, %v5723_v14 }
  0xf3   :  { %3822 = vmatpush3.msra.mxu1 %v5377_v13  ;;  %3833 = vmatpush3.msra.mxu0 %v5610_v29  ;;  %7028 = vst [vmem:[#allocation28_spill] sm:$0xff] %v5794_v59  ;;  %v5800_v13 = vsub.f32 %v120_v6, %v5758_v1  ;;  %v5817_v6 = vsub.f32 %v5718_v61, %v6744_v8  ;;  %v2144_v8 = vand.u32 4294901760, %v5792_v34  ;;  %v7034_v34 = vand.u32 4294901760, %v5761_v36 }
  0xf4   :  { %3823 = vmatprep.subr.mxu1 %v5383_v3  ;;  %3834 = vmatprep.subr.mxu0 %v5633_v37  ;;  %v5812_v3 = vsub.f32 %v5727_v42, %v6743_v58  ;;  %v5827_v58 = vand.u32 4294901760, %v117_v52  ;;  %v5832_v32 = vsub.f32 %v119_v26, %v5794_v59  ;;  %v116_v37 = vld [vmem:[#allocation6 + $0x218] sm:$0xff]  ;;  %v5850_v26 = vand.u32 4294901760, %v133_v56  ;;  %7037 = vst [vmem:[#allocation25_spill] sm:$0xff] %v5865_v30 }
  0xf5   :  { %7029 = vst [vmem:[#allocation34_spill] sm:$0xff] %v5800_v13  ;;  %3824 = vmatpush3.msra.mxu1 %v5385_v57  ;;  %1880 = vmatprep.mubr.f32.mxu1 %v7017_v10  ;;  %v5824_v10 = vand.u32 4294901760, %v134_v54  ;;  %v5840_v57 = vsub.f32 %v136_v63, %v5776_v19  ;;  %v7039_v63 = vand.u32 4294901760, %v5784_v60 }
  0xf6   :  { %3835 = vmatpush3.msra.mxu0 %v5621_v45  ;;  %1882 = vmatmul.mubr.f32.vlgmr.msra.gmra.mxu1 %v7021_v38  ;;  %7031 = vst [vmem:[#allocation38_spill] sm:$0xff] %v5827_v58  ;;  %v7032_v45 = vand.u32 4294901760, %v5744_v25 }
  0xf7   :  { %7030 = vst [vmem:[#allocation33_spill] sm:$0xff] %v5824_v10  ;;  %3836 = vmatprep.subr.mxu0 %v5653_v7  ;;  %3863 = vmatprep.subr.mxu1 %v2116_v53  ;;  %v7033_v7 = vand.u32 4294901760, %v5662_v22  ;;  %v5848_v53 = vsub.f32 %v5761_v36, %v7034_v34  ;;  %v2039_v22 = vand.u32 4294901760, %v5817_v6  ;;  %v5862_v34 = vsub.f32 %v118_v48, %v5819_v16  ;;  %v115_v48 = vld [vmem:[#allocation6 + $0x210] sm:$0xff] }
  0xf8   :  { %v5837_v38 = vsub.f32 %v5744_v25, %v7032_v45  ;;  %3837 = vmatpush3.msra.mxu0 %v5645_v47  ;;  %v7035_v45 = vand.u32 4294901760, %v5756_v62  ;;  %v46_v25 = vld [vmem:[#allocation3 + $0x20] sm:$0xff]  ;;  %v132_v47 = vld [vmem:[#allocation6 + $0x298] sm:$0xff]  ;;  %v5878_v6 = vand.u32 4294901760, %v116_v37 }
  0xf9   :  { %3864 = vmatpush3.msra.mxu1 %v7033_v7  ;;  %3838 = vmatprep.subr.mxu0 %v5668_v11  ;;  %v2151_v7 = vand.u32 4294901760, %v5812_v3  ;;  %7036 = vst [vmem:[#allocation32_spill] sm:$0xff] %v5862_v34  ;;  %v5876_v3 = vsub.f32 %v117_v52, %v5827_v58  ;;  %v5880_v11 = vand.u32 4294901760, %v47_v5  ;;  %v5890_v52 = vand.u32 4294901760, %v46_v25 }
  0xfa   :  { %v5855_v29 = vsub.f32 %v5756_v62, %v7035_v45  ;;  %3865 = vmatprep.subr.mxu1 %v2123_v31  ;;  %3839 = vmatpush3.msra.mxu0 %v5670_v55  ;;  %v7038_v45 = vand.u32 4294901760, %v5694_v0  ;;  %v5873_v31 = vsub.f32 %v5784_v60, %v7039_v63  ;;  %v2046_v0 = vand.u32 4294901760, %v5837_v38  ;;  %v131_v55 = vld [vmem:[#allocation6 + $0x290] sm:$0xff] }
  0xfb   :  { %7040 = vst [vmem:[#allocation24_spill] sm:$0xff] %v5880_v11  ;;  %3840 = vmatprep.subr.mxu0 %v5711_v27  ;;  %v5888_v63 = vsub.f32 %v134_v54, %v5824_v10  ;;  %7042 = vst [vmem:[#allocation40_spill] sm:$0xff] %v5890_v52  ;;  %v7043_v62 = vand.u32 4294901760, %v5735_v50  ;;  %v2158_v27 = vand.u32 4294901760, %v5848_v53  ;;  %v7044_v38 = vand.u32 4294901760, %v5800_v13  ;;  %v130_v54 = vld [vmem:[#allocation6 + $0x288] sm:$0xff]  ;;  %2224 = vmatprep.mubr.f32.mxu1 %v5880_v11 }
  0xfc   :  { %3866 = vmatpush3.msra.mxu1 %v7038_v45  ;;  %3841 = vmatpush3.msra.mxu0 %v5696_v24  ;;  %v2053_v14 = vand.u32 4294901760, %v5855_v29  ;;  %v5906_v60 = vand.u32 4294901760, %v115_v48  ;;  %v5910_v29 = vsub.f32 %v133_v56, %v5850_v26  ;;  %v7045_v53 = vand.u32 4294901760, %v5749_v46 }
  0xfd   :  { %3867 = vmatprep.subr.mxu1 %v7041_v40  ;;  %v5897_v40 = vand.u32 4294901760, %v132_v47  ;;  %v5902_v45 = vsub.f32 %v5800_v13, %v7044_v38  ;;  %3842 = vmatprep.subr.mxu0 %v5737_v21  ;;  %v2165_v38 = vand.u32 4294901760, %v5873_v31  ;;  %v5917_v21 = vsub.f32 %v116_v37, %v5878_v6  ;;  %v129_v31 = vld [vmem:[#allocation6 + $0x280] sm:$0xff] }
  0xfe   :  { %3868 = vmatpush3.msra.mxu1 %v7043_v62  ;;  %v114_v62 = vld [vmem:[#allocation6 + $0x208] sm:$0xff]  ;;  %3843 = vmatpush3.msra.mxu0 %v5713_v20  ;;  %v5922_v24 = vsub.f32 %v47_v5, %v5880_v11  ;;  %v7047_v56 = vand.u32 4294901760, %v5840_v57  ;;  %v5928_v20 = vand.u32 4294901760, %v130_v54  ;;  %v5932_v37 = vsub.f32 %v46_v25, %v5890_v52 }
  0xff   :  { %3869 = vmatprep.subr.mxu1 %v2137_v44  ;;  %v5919_v44 = vand.u32 4294901760, %v131_v55  ;;  %3844 = vmatprep.subr.mxu0 %v5776_v19  ;;  %v7048_v5 = vand.u32 4294901760, %v5781_v17  ;;  %v5938_v19 = vand.u32 4294901760, %v114_v62  ;;  %v5942_v13 = vsub.f32 %v132_v47, %v5897_v40 }
 0x100   :  { %3870 = vmatpush3.msra.mxu1 %v7045_v53  ;;  %v2171_v50 = vsub.f32 %v5840_v57, %v7047_v56  ;;  %v113_v53 = vld [vmem:[#allocation6 + $0x200] sm:$0xff]  ;;  %3845 = vmatpush3.msra.mxu0 %v5758_v1  ;;  %v7049_v25 = vand.u32 4294901760, %v5865_v30  ;;  %v5949_v1 = vsub.f32 %v115_v48, %v5906_v60  ;;  %v7050_v17 = vand.u32 4294901760, %v5832_v32 }
 0x101   :  { %7046 = vst [vmem:[#allocation39_spill] sm:$0xff] %v5919_v44  ;;  %3871 = vmatprep.subr.mxu1 %v2144_v8  ;;  %v2060_v8 = vand.u32 4294901760, %v5902_v45  ;;  %3846 = vmatprep.subr.mxu0 %v5802_v43  ;;  %v5956_v47 = vand.u32 4294901760, %v129_v31  ;;  %v5958_v56 = vand.u32 4294901760, %v113_v53 }
 0x102   :  { %3872 = vmatpush3.msra.mxu1 %v7048_v5  ;;  %v2178_v46 = vsub.f32 %v5865_v30, %v7049_v25  ;;  %v2066_v45 = vsub.f32 %v5832_v32, %v7050_v17  ;;  %3847 = vmatpush3.msra.mxu0 %v5794_v59  ;;  %v5962_v25 = vsub.f32 %v131_v55, %v5919_v44  ;;  %v2172_v48 = vand.u32 4294901760, %v2171_v50 }
 0x103   :  { %3873 = vmatprep.subr.mxu1 %v2151_v7  ;;  %3848 = vmatprep.subr.mxu0 %v5824_v10  ;;  %v7051_v17 = vand.u32 4294901760, %v5888_v63  ;;  %v5972_v7 = vsub.f32 %v114_v62, %v5938_v19  ;;  %v7052_v55 = vand.u32 4294901760, %v5862_v34  ;;  %v5979_v50 = vsub.f32 %v130_v54, %v5928_v20 }
 0x104   :  { %3874 = vmatpush3.msra.mxu1 %v2039_v22  ;;  %3849 = vmatpush3.msra.mxu0 %v5819_v16  ;;  %v2067_v22 = vand.u32 4294901760, %v2066_v45  ;;  %v7053_v59 = vand.u32 4294901760, %v5910_v29  ;;  %v7055_v54 = vand.u32 4294901760, %v5922_v24  ;;  %v7056_v45 = vand.u32 4294901760, %v5876_v3 }
 0x105   :  { %3875 = vmatprep.subr.mxu1 %v2158_v27  ;;  %v2185_v5 = vsub.f32 %v5888_v63, %v7051_v17  ;;  %v2073_v10 = vsub.f32 %v5862_v34, %v7052_v55  ;;  %3850 = vmatprep.subr.mxu0 %v5850_v26  ;;  %v2179_v17 = vand.u32 4294901760, %v2178_v46  ;;  %v5988_v55 = vsub.f32 %v113_v53, %v5958_v56 }
 0x106   :  { %3876 = vmatpush3.msra.mxu1 %v2046_v0  ;;  %v2192_v0 = vsub.f32 %v5910_v29, %v7053_v59  ;;  %3851 = vmatpush3.msra.mxu0 %v5827_v58  ;;  %v1986_v27 = vsub.f32 %v5922_v24, %v7055_v54  ;;  %v5995_v46 = vsub.f32 %v129_v31, %v5956_v47  ;;  %v7057_v53 = vand.u32 4294901760, %v5932_v37 }
 0x107   :  { %3877 = vmatprep.subr.mxu1 %v2165_v38  ;;  %7054 = vst [vmem:[#allocation36_spill] sm:$0xff] %v5988_v55  ;;  %3852 = vmatprep.subr.mxu0 %v5897_v40  ;;  %v2186_v59 = vand.u32 4294901760, %v2185_v5  ;;  %v2074_v54 = vand.u32 4294901760, %v2073_v10  ;;  %v7058_v31 = vand.u32 4294901760, %v5942_v13  ;;  %v6789_v58 = vand.u32 4294901760, %v5988_v55 }
 0x108   :  { %3878 = vmatpush3.msra.mxu1 %v2053_v14  ;;  %v2080_v14 = vsub.f32 %v5876_v3, %v7056_v45  ;;  %v1992_v62 = vsub.f32 %v5932_v37, %v7057_v53  ;;  %3853 = vmatpush3.msra.mxu0 %v5878_v6  ;;  %v7059_v45 = vand.u32 4294901760, %v5917_v21  ;;  %v1987_v10 = vand.u32 4294901760, %v1986_v27 }
 0x109   :  { %3879 = vmatprep.subr.mxu1 %v2172_v48  ;;  %v2199_v38 = vsub.f32 %v5942_v13, %v7058_v31  ;;  %3854 = vmatprep.subr.mxu0 %v5919_v44  ;;  %v2193_v48 = vand.u32 4294901760, %v2192_v0  ;;  %v6790_v5 = vand.u32 4294901760, %v5995_v46  ;;  %v7061_v44 = vand.u32 4294901760, %v5949_v1 }
 0x10a   :  { %3880 = vmatpush3.msra.mxu1 %v2060_v8  ;;  %v2087_v53 = vsub.f32 %v5917_v21, %v7059_v45  ;;  %3855 = vmatpush3.msra.mxu0 %v5906_v60  ;;  %v7060_v8 = vand.u32 4294901760, %v5962_v25  ;;  %v1993_v0 = vand.u32 4294901760, %v1992_v62  ;;  %v7062_v27 = vand.u32 4294901760, %v5979_v50 }
 0x10b   :  { %3881 = vmatprep.subr.mxu1 %v2179_v17  ;;  %3856 = vmatprep.subr.mxu0 %v5928_v20  ;;  %v2081_v17 = vand.u32 4294901760, %v2080_v14  ;;  %v2094_v45 = vsub.f32 %v5949_v1, %v7061_v44  ;;  %v7063_v62 = vand.u32 4294901760, %v5972_v7 }
 0x10c   :  { %3882 = vmatpush3.msra.mxu1 %v2067_v22  ;;  %v2206_v31 = vsub.f32 %v5962_v25, %v7060_v8  ;;  %3857 = vmatpush3.msra.mxu0 %v5938_v19  ;;  %v2200_v22 = vand.u32 4294901760, %v2199_v38  ;;  %v2213_v8 = vsub.f32 %v5979_v50, %v7062_v27  ;;  %v2220_v38 = vsub.f32 %v5995_v46, %v6790_v5  ;;  %v7064_v27 = vld [vmem:[#allocation13_spill] sm:$0xff]  ;;  %v7075_v5 = vld [vmem:[#allocation31_spill] sm:$0xff] }
 0x10d   :  { %3883 = vmatprep.subr.mxu1 %v2186_v59  ;;  %3858 = vmatprep.subr.mxu0 %v5956_v47  ;;  %v2088_v59 = vand.u32 4294901760, %v2087_v53  ;;  %v2101_v14 = vsub.f32 %v5972_v7, %v7063_v62  ;;  %v7067_v62 = vld [vmem:[#allocation27_spill] sm:$0xff] }
 0x10e   :  { %3884 = vmatpush3.msra.mxu1 %v2074_v54  ;;  %3859 = vmatpush3.msra.mxu0 %v5958_v56  ;;  %v2207_v44 = vand.u32 4294901760, %v2206_v31  ;;  %v2095_v54 = vand.u32 4294901760, %v2094_v45  ;;  %v2214_v53 = vand.u32 4294901760, %v2213_v8  ;;  %v2221_v31 = vand.u32 4294901760, %v2220_v38  ;;  %v7065_v8 = vld [vmem:[#allocation20_spill] sm:$0xff]  ;;  %v7069_v38 = vld [vmem:[#allocation19_spill] sm:$0xff] }
 0x10f   :  { %3885 = vmatprep.subr.mxu1 %v2193_v48  ;;  %1988 = vmatprep.mubr.f32.mxu0 %v1987_v10  ;;  %v2108_v48 = vsub.f32 %v5988_v55, %v6789_v58  ;;  %v2102_v10 = vand.u32 4294901760, %v2101_v14  ;;  %v7068_v14 = vld [vmem:[#allocation23_spill] sm:$0xff] }
 0x110   :  { %3886 = vmatpush3.msra.mxu1 %v2081_v17  ;;  %1994 = vmatmul.mubr.f32.vlgmr.msra.gmra.mxu0 %v1993_v0  ;;  %v3440_v0 = vpop.f32.mrf.mxu0 }
 0x111   :  { %3887 = vmatprep.subr.mxu1 %v2200_v22  ;;  %3898 = vmatprep.subr.mxu0 %v5613_v51  ;;  %v2109_v17 = vand.u32 4294901760, %v2108_v48  ;;  %v3475_v22 = vpop.f32.mrf.mxu1  ;;  %v162_v48 = vstv %s6595_s2  ;;  %s4431_s2 = smov [#allocation8]  }
 0x112   :  { %3888 = vmatpush3.msra.mxu1 %v2088_v59  ;;  %3899 = vmatpush3.msra.mxu0 %v5598_v41  ;;  %v3441_v45 = vpop.f32.mrf.mxu0  ;;  %v7066_v59 = vld [vmem:[#allocation26_spill] sm:$0xff]  ;;  %s3398_s24 = sshll.u32 %s4431_s2, 4  ;;  %s3399_s24 = int_to_ptr.vmem [resolvable:$true] %s3398_s24 }
 0x113   :  { %3889 = vmatprep.subr.mxu1 %v2207_v44  ;;  %3900 = vmatprep.subr.mxu0 %v5628_v23  ;;  %v3442_v44 = vadd.f32 %v3441_v45, %v3440_v0  ;;  %v7074_v0 = vld [vmem:[#allocation30_spill] sm:$0xff]  ;;  %s4399_s25 = scalar_lea.vmem %s3399_s24, 128  ;;  %p4404_p11 = scmp.lt.s32.totalorder %s3399_s24, %s3399_s24 }
 0x114   :  { %3890 = vmatpush3.msra.mxu1 %v2095_v54  ;;  %3901 = vmatpush3.msra.mxu0 %v5619_v2  ;;  %v7070_v54 = vld [vmem:[#allocation12_spill] sm:$0xff]  ;;  %p4400_p10 = scmp.ne.s32.totalorder %s3399_s24, %s4399_s25  ;;  %p4405_p12 = scmp.lt.s32.totalorder %s4399_s25, %s4399_s25 }
 0x115   :  { %3891 = vmatprep.subr.mxu1 %v2214_v53  ;;  %3902 = vmatprep.subr.mxu0 %v5636_v12  ;;  %v3476_v53 = vpop.f32.mrf.mxu1  ;;  %v272_v45 = vadd.f32 %v3442_v44, %v162_v48 }
 0x116   :  { %3892 = vmatpush3.msra.mxu1 %v2102_v10  ;;  %3903 = vmatpush3.msra.mxu0 %v5642_v49  ;;  %v7071_v10 = vld [vmem:[#allocation29_spill] sm:$0xff]  ;;  %v3477_v58 = vadd.f32 %v3476_v53, %v3475_v22  ;;  %v7079_v22 = vld [vmem:[#allocation18_spill] sm:$0xff]  ;;  %p4406_p13 = por %p4405_p12, %p4404_p11 }
 0x117   :  { %3893 = vmatprep.subr.mxu1 %v2221_v31  ;;  %3904 = vmatprep.subr.mxu0 %v5674_v18  ;;  %v7072_v31 = vld [vmem:[#allocation34_spill] sm:$0xff] }
 0x118   :  { %3894 = vmatpush3.msra.mxu1 %v2109_v17  ;;  %3905 = vmatpush3.msra.mxu0 %v5651_v9  ;;  %v7073_v17 = vld [vmem:[#allocation14_spill] sm:$0xff]  ;;  %v504_v44 = vadd.f32 %v3477_v58, %v272_v45  ;;  %v7082_v58 = vld [vmem:[#allocation28_spill] sm:$0xff]  ;;  %v7085_v45 = vand.u32 4294901760, %v5613_v51  ;;  %v7090_v51 = vand.u32 4294901760, %v5636_v12  ;;  %v7095_v12 = vand.u32 4294901760, %v5932_v37  ;;  %p4407_p0 = pnand %p4406_p13, %p4400_p10 }
 0x119   :  { %2226 = vmatmul.mubr.f32.vlgmr.msra.gmra.mxu1 %v5890_v52  ;;  %3906 = vmatprep.subr.mxu0 %v5700_v39  ;;  %v7076_v52 = vld [vmem:[#allocation16_spill] sm:$0xff]  ;;  %v7080_v53 = vld [vmem:[#allocation22_spill] sm:$0xff] }
 0x11a   :  { %3933 = vmatprep.subr.mxu1 %v5587_v4  ;;  %3907 = vmatpush3.msra.mxu0 %v5685_v33 }
 0x11b   :  { %3934 = vmatpush3.msra.mxu1 %v5579_v15  ;;  %3908 = vmatprep.subr.mxu0 %v5727_v42 }
 0x11c   :  { %3935 = vmatprep.subr.mxu1 %v5600_v35  ;;  %3909 = vmatpush3.msra.mxu0 %v5718_v61 }
 0x11d   :  { %3936 = vmatpush3.msra.mxu1 %v5592_v28  ;;  %3910 = vmatprep.subr.mxu0 %v5761_v36 }
 0x11e   :  { %3937 = vmatprep.subr.mxu1 %v7064_v27  ;;  %3911 = vmatpush3.msra.mxu0 %v7065_v8 }
 0x11f   :  { %3938 = vmatpush3.msra.mxu1 %v7066_v59  ;;  %3912 = vmatprep.subr.mxu0 %v7067_v62 }
 0x120   :  { %3939 = vmatprep.subr.mxu1 %v7068_v14  ;;  %3913 = vmatpush3.msra.mxu0 %v7069_v38 }
 0x121   :  { %3940 = vmatpush3.msra.mxu1 %v7070_v54  ;;  %3914 = vmatprep.subr.mxu0 %v5840_v57 }
 0x122   :  { %3941 = vmatprep.subr.mxu1 %v7071_v10  ;;  %3915 = vmatpush3.msra.mxu0 %v7072_v31  ;;  %v7077_v31 = vld [vmem:[#allocation15_spill] sm:$0xff] }
 0x123   :  { %3942 = vmatpush3.msra.mxu1 %v7073_v17  ;;  %3916 = vmatprep.subr.mxu0 %v5865_v30  ;;  %v7078_v30 = vld [vmem:[#allocation17_spill] sm:$0xff] }
 0x124   :  { %3943 = vmatprep.subr.mxu1 %v7074_v0  ;;  %3917 = vmatpush3.msra.mxu0 %v5832_v32 }
 0x125   :  { %3944 = vmatpush3.msra.mxu1 %v7075_v5  ;;  %3918 = vmatprep.subr.mxu0 %v5888_v63  ;;  %v3510_v11 = vpop.f32.mrf.mxu0 }
 0x126   :  { %3945 = vmatprep.subr.mxu1 %v7076_v52  ;;  %3919 = vmatpush3.msra.mxu0 %v5862_v34  ;;  %v7081_v34 = vld [vmem:[#allocation21_spill] sm:$0xff] }
 0x127   :  { %3946 = vmatpush3.msra.mxu1 %v7077_v31  ;;  %3920 = vmatprep.subr.mxu0 %v5910_v29  ;;  %v3511_v0 = vpop.f32.mrf.mxu0 }
 0x128   :  { %3947 = vmatprep.subr.mxu1 %v7078_v30  ;;  %3921 = vmatpush3.msra.mxu0 %v5876_v3  ;;  %v3512_v48 = vadd.f32 %v3511_v0, %v3510_v11  ;;  %v7083_v11 = vld [vmem:[#allocation33_spill] sm:$0xff]  ;;  %v7084_v0 = vld [vmem:[#allocation38_spill] sm:$0xff] }
 0x129   :  { %3948 = vmatpush3.msra.mxu1 %v7079_v22  ;;  %3922 = vmatprep.subr.mxu0 %v5942_v13 }
 0x12a   :  { %3949 = vmatprep.subr.mxu1 %v7080_v53  ;;  %3923 = vmatpush3.msra.mxu0 %v5917_v21  ;;  %v6089_v31 = vadd.f32 %v3512_v48, %v504_v44  ;;  %v7086_v44 = vand.u32 4294901760, %v5598_v41  ;;  %v7087_v48 = vld [vmem:[#allocation39_spill] sm:$0xff]  ;;  %v7091_v41 = vand.u32 4294901760, %v5642_v49  ;;  %v7097_v49 = vand.u32 4294901760, %v5685_v33  ;;  %v7105_v33 = vld [vmem:[#allocation34_spill] sm:$0xff] }
 0x12b   :  { %3950 = vmatpush3.msra.mxu1 %v7081_v34  ;;  %3924 = vmatprep.subr.mxu0 %v5962_v25 }
 0x12c   :  { %3951 = vmatprep.subr.mxu1 %v5802_v43  ;;  %3925 = vmatpush3.msra.mxu0 %v5949_v1 }
 0x12d   :  { %3952 = vmatpush3.msra.mxu1 %v7082_v58  ;;  %3926 = vmatprep.subr.mxu0 %v5979_v50 }
 0x12e   :  { %3953 = vmatprep.subr.mxu1 %v7083_v11  ;;  %3927 = vmatpush3.msra.mxu0 %v5972_v7 }
 0x12f   :  { %3954 = vmatpush3.msra.mxu1 %v5819_v16  ;;  %3928 = vmatprep.subr.mxu0 %v5995_v46 }
 0x130   :  { %3955 = vmatprep.subr.mxu1 %v5850_v26  ;;  %3929 = vmatpush3.msra.mxu0 %v5988_v55  ;;  %v7088_v55 = vand.u32 4294901760, %v5628_v23  ;;  %v7092_v23 = vand.u32 4294901760, %v5674_v18  ;;  %v7098_v18 = vand.u32 4294901760, %v5727_v42  ;;  %v7107_v42 = vld [vmem:[#allocation25_spill] sm:$0xff] }
 0x131   :  { %2361 = vmatprep.mubr.f32.mxu0 %v5922_v24  ;;  %3956 = vmatpush3.msra.mxu1 %v7084_v0  ;;  %v7089_v0 = vand.u32 4294901760, %v5619_v2  ;;  %v7093_v2 = vand.u32 4294901760, %v5922_v24  ;;  %v3545_v24 = vpop.f32.mrf.mxu1 }
 0x132   :  { %2364 = vmatmul.mubr.f32.vlgmr.msra.gmra.mxu0 %v5932_v37  ;;  %3957 = vmatprep.subr.mxu1 %v5897_v40  ;;  %v7108_v37 = vand.u32 4294901760, %v7107_v42 }
 0x133   :  { %3968 = vmatprep.subr.mxu0 %v7085_v45  ;;  %3958 = vmatpush3.msra.mxu1 %v5878_v6  ;;  %v7115_v45 = vand.u32 4294901760, %v5910_v29 }
 0x134   :  { %3969 = vmatpush3.msra.mxu0 %v7086_v44  ;;  %3959 = vmatprep.subr.mxu1 %v7087_v48 }
 0x135   :  { %3970 = vmatprep.subr.mxu0 %v7088_v55  ;;  %3960 = vmatpush3.msra.mxu1 %v5906_v60  ;;  %v7094_v55 = vand.u32 4294901760, %v5651_v9  ;;  %v7099_v9 = vand.u32 4294901760, %v5718_v61  ;;  %v7106_v61 = vand.u32 4294901760, %v7105_v33 }
 0x136   :  { %3971 = vmatpush3.msra.mxu0 %v7089_v0  ;;  %3961 = vmatprep.subr.mxu1 %v5928_v20  ;;  %v7096_v0 = vand.u32 4294901760, %v5700_v39  ;;  %v7100_v39 = vand.u32 4294901760, %v5761_v36  ;;  %v7104_v36 = vand.u32 4294901760, %v5840_v57  ;;  %v7111_v57 = vand.u32 4294901760, %v5888_v63 }
 0x137   :  { %3972 = vmatprep.subr.mxu0 %v7090_v51  ;;  %3962 = vmatpush3.msra.mxu1 %v5938_v19  ;;  %v7116_v63 = vand.u32 4294901760, %v5876_v3  ;;  %v158_v51 = vld [vmem:[#allocation6 + $0x368] sm:$0xff] }
 0x138   :  { %3973 = vmatpush3.msra.mxu0 %v7091_v41  ;;  %3963 = vmatprep.subr.mxu1 %v5956_v47  ;;  %v7117_v41 = vand.u32 4294901760, %v5942_v13  ;;  %v157_v13 = vld [vmem:[#allocation6 + $0x360] sm:$0xff] }
 0x139   :  { %3974 = vmatprep.subr.mxu0 %v7092_v23  ;;  %3964 = vmatpush3.msra.mxu1 %v5958_v56  ;;  %v7120_v23 = vand.u32 4294901760, %v5949_v1  ;;  %v6214_v1 = vand.u32 4294901760, %v157_v13 }
 0x13a   :  { %2468 = vmatprep.mubr.f32.mxu1 %v7093_v2  ;;  %3975 = vmatpush3.msra.mxu0 %v7094_v55  ;;  %v7124_v2 = vld [vmem:[#allocation36_spill] sm:$0xff] }
 0x13b   :  { %2472 = vmatmul.mubr.f32.vlgmr.msra.gmra.mxu1 %v7095_v12  ;;  %3976 = vmatprep.subr.mxu0 %v7096_v0  ;;  %v7125_v55 = vand.u32 4294901760, %v7124_v2  ;;  %v7126_v12 = vld [vmem:[#allocation24_spill] sm:$0xff]  ;;  %v7127_v0 = vld [vmem:[#allocation38_spill] sm:$0xff] }
 0x13c   :  { %4003 = vmatprep.subr.mxu1 %v5587_v4  ;;  %3977 = vmatpush3.msra.mxu0 %v7097_v49  ;;  %v7101_v4 = vand.u32 4294901760, %v7065_v8  ;;  %v7128_v49 = vld [vmem:[#allocation40_spill] sm:$0xff] }
 0x13d   :  { %4004 = vmatpush3.msra.mxu1 %v5579_v15  ;;  %3978 = vmatprep.subr.mxu0 %v7098_v18  ;;  %v7102_v15 = vand.u32 4294901760, %v7067_v62  ;;  %v4429_v18 = vmov 0.0  }
 0x13e   :  { %4005 = vmatprep.subr.mxu1 %v5600_v35  ;;  %3979 = vmatpush3.msra.mxu0 %v7099_v9  ;;  %v7103_v35 = vand.u32 4294901760, %v7069_v38  ;;  %v7112_v38 = vld [vmem:[#allocation32_spill] sm:$0xff]  ;;  %v6234_v9 = vsub.f32 %v157_v13, %v6214_v1 }
 0x13f   :  { %4006 = vmatpush3.msra.mxu1 %v5592_v28  ;;  %3980 = vmatprep.subr.mxu0 %v7100_v39  ;;  %v3546_v28 = vpop.f32.mrf.mxu1 }
 0x140   :  { %4007 = vmatprep.subr.mxu1 %v7064_v27  ;;  %3981 = vmatpush3.msra.mxu0 %v7101_v4  ;;  %v7109_v27 = vld [vmem:[#allocation30_spill] sm:$0xff]  ;;  %v3547_v8 = vadd.f32 %v3546_v28, %v3545_v24  ;;  %v153_v4 = vld [vmem:[#allocation6 + $0x340] sm:$0xff]  ;;  %v2864_v33 = vand.u32 4294901760, %v6234_v9 }
 0x141   :  { %4008 = vmatpush3.msra.mxu1 %v7066_v59  ;;  %3982 = vmatprep.subr.mxu0 %v7102_v15  ;;  %v7110_v59 = vand.u32 4294901760, %v5832_v32 }
 0x142   :  { %4009 = vmatprep.subr.mxu1 %v7068_v14  ;;  %3983 = vmatpush3.msra.mxu0 %v7103_v35  ;;  %v160_v14 = vld [vmem:[#allocation6 + $0x378] sm:$0xff] }
 0x143   :  { %4010 = vmatpush3.msra.mxu1 %v7070_v54  ;;  %3984 = vmatprep.subr.mxu0 %v7104_v36  ;;  %v7113_v54 = vand.u32 4294901760, %v7112_v38  ;;  %v6261_v36 = vand.u32 4294901760, %v153_v4 }
 0x144   :  { %4011 = vmatprep.subr.mxu1 %v7071_v10  ;;  %3985 = vmatpush3.msra.mxu0 %v7106_v61  ;;  %v7114_v10 = vld [vmem:[#allocation15_spill] sm:$0xff]  ;;  %v151_v61 = vld [vmem:[#allocation6 + $0x330] sm:$0xff] }
 0x145   :  { %4012 = vmatpush3.msra.mxu1 %v7073_v17  ;;  %3986 = vmatprep.subr.mxu0 %v7108_v37  ;;  %v159_v17 = vld [vmem:[#allocation6 + $0x370] sm:$0xff] }
 0x146   :  { %4013 = vmatprep.subr.mxu1 %v7109_v27  ;;  %3987 = vmatpush3.msra.mxu0 %v7110_v59  ;;  %v6187_v29 = vand.u32 4294901760, %v159_v17  ;;  %v2865_v59 = vsub.f32 %v6234_v9, %v2864_v33 }
 0x147   :  { %4014 = vmatpush3.msra.mxu1 %v7075_v5  ;;  %3988 = vmatprep.subr.mxu0 %v7111_v57  ;;  %v3580_v62 = vpop.f32.mrf.mxu0  ;;  %v750_v5 = vadd.f32 %v3547_v8, %v6089_v31  ;;  %v7119_v31 = vand.u32 4294901760, %v5962_v25  ;;  %v150_v8 = vld [vmem:[#allocation6 + $0x328] sm:$0xff]  ;;  %v6287_v57 = vand.u32 4294901760, %v151_v61 }
 0x148   :  { %4015 = vmatprep.subr.mxu1 %v7076_v52  ;;  %3989 = vmatpush3.msra.mxu0 %v7113_v54  ;;  %v6182_v52 = vand.u32 4294901760, %v160_v14  ;;  %v6209_v25 = vsub.f32 %v159_v17, %v6187_v29  ;;  %v6299_v54 = vand.u32 4294901760, %v150_v8  ;;  %v149_v17 = vld [vmem:[#allocation6 + $0x320] sm:$0xff] }
 0x149   :  { %4016 = vmatpush3.msra.mxu1 %v7114_v10  ;;  %3990 = vmatprep.subr.mxu0 %v7115_v45  ;;  %v3581_v32 = vpop.f32.mrf.mxu0  ;;  %v48_v45 = vld [vmem:[#allocation3 + $0x30] sm:$0xff] }
 0x14a   :  { %4017 = vmatprep.subr.mxu1 %v7078_v30  ;;  %3991 = vmatpush3.msra.mxu0 %v7116_v63  ;;  %v3582_v44 = vadd.f32 %v3581_v32, %v3580_v62  ;;  %v7118_v30 = vand.u32 4294901760, %v5917_v21  ;;  %v6203_v21 = vsub.f32 %v160_v14, %v6182_v52  ;;  %v2866_v32 = vand.u32 4294901760, %v2865_v59 }
 0x14b   :  { %4018 = vmatpush3.msra.mxu1 %v7079_v22  ;;  %3992 = vmatprep.subr.mxu0 %v7117_v41  ;;  %v6197_v22 = vand.u32 4294901760, %v158_v51 }
 0x14c   :  { %4019 = vmatprep.subr.mxu1 %v7080_v53  ;;  %3993 = vmatpush3.msra.mxu0 %v7118_v30  ;;  %v6192_v3 = vadd.f32 %v3582_v44, %v750_v5  ;;  %v7122_v53 = vand.u32 4294901760, %v5972_v7  ;;  %v6306_v5 = vsub.f32 %v151_v61, %v6287_v57  ;;  %v6314_v30 = vand.u32 4294901760, %v149_v17 }
 0x14d   :  { %4020 = vmatpush3.msra.mxu1 %v7081_v34  ;;  %3994 = vmatprep.subr.mxu0 %v7119_v31  ;;  %v7121_v34 = vand.u32 4294901760, %v5979_v50  ;;  %v6220_v50 = vsub.f32 %v158_v51, %v6197_v22  ;;  %v148_v51 = vld [vmem:[#allocation6 + $0x318] sm:$0xff]  ;;  %v6316_v31 = vand.u32 4294901760, %v48_v45 }
 0x14e   :  { %4021 = vmatprep.subr.mxu1 %v5802_v43  ;;  %3995 = vmatpush3.msra.mxu0 %v7120_v23  ;;  %v156_v43 = vld [vmem:[#allocation6 + $0x358] sm:$0xff]  ;;  %v6320_v23 = vsub.f32 %v150_v8, %v6299_v54 }
 0x14f   :  { %4022 = vmatpush3.msra.mxu1 %v7082_v58  ;;  %3996 = vmatprep.subr.mxu0 %v7121_v34  ;;  %v7123_v58 = vand.u32 4294901760, %v5995_v46  ;;  %v6225_v7 = vand.u32 4294901760, %v156_v43  ;;  %v2850_v46 = vand.u32 4294901760, %v6209_v25  ;;  %v2857_v39 = vand.u32 4294901760, %v6220_v50 }
 0x150   :  { %4023 = vmatprep.subr.mxu1 %v7083_v11  ;;  %3997 = vmatpush3.msra.mxu0 %v7122_v53  ;;  %v155_v11 = vld [vmem:[#allocation6 + $0x350] sm:$0xff]  ;;  %v3615_v41 = vpop.f32.mrf.mxu1 }
 0x151   :  { %4024 = vmatpush3.msra.mxu1 %v5819_v16  ;;  %3998 = vmatprep.subr.mxu0 %v7123_v58  ;;  %v2843_v16 = vand.u32 4294901760, %v6203_v21  ;;  %v6236_v24 = vand.u32 4294901760, %v155_v11  ;;  %v147_v53 = vld [vmem:[#allocation6 + $0x310] sm:$0xff]  ;;  %v6328_v58 = vand.u32 4294901760, %v148_v51 }
 0x152   :  { %4025 = vmatprep.subr.mxu1 %v5850_v26  ;;  %3999 = vmatpush3.msra.mxu0 %v7125_v55  ;;  %v154_v26 = vld [vmem:[#allocation6 + $0x348] sm:$0xff]  ;;  %v2906_v55 = vand.u32 4294901760, %v6306_v5 }
 0x153   :  { %2638 = vmatprep.mubr.f32.mxu0 %v7126_v12  ;;  %4026 = vmatpush3.msra.mxu1 %v7127_v0  ;;  %v2844_v15 = vsub.f32 %v6203_v21, %v2843_v16  ;;  %v6249_v35 = vand.u32 4294901760, %v154_v26  ;;  %v6259_v28 = vsub.f32 %v155_v11, %v6236_v24  ;;  %v3616_v0 = vpop.f32.mrf.mxu1  ;;  %v6353_v61 = vsub.f32 %v148_v51, %v6328_v58 }
 0x154   :  { %2640 = vmatmul.mubr.f32.vlgmr.msra.gmra.mxu0 %v7128_v49  ;;  %4027 = vmatprep.subr.mxu1 %v5897_v40  ;;  %v6244_v40 = vsub.f32 %v156_v43, %v6225_v7  ;;  %v2907_v59 = vsub.f32 %v6306_v5, %v2906_v55 }
 0x155   :  { %4140 = vmatprep.subr.mxu0 %v4429_v18  ;;  %4028 = vmatpush3.msra.mxu1 %v5878_v6  ;;  %v2851_v6 = vsub.f32 %v6209_v25, %v2850_v46  ;;  %v6272_v42 = vsub.f32 %v154_v26, %v6249_v35  ;;  %v2878_v62 = vand.u32 4294901760, %v6259_v28  ;;  %v6340_v26 = vand.u32 4294901760, %v147_v53 }
 0x156   :  { %4141 = vmatpush3.msra.mxu0 %v6182_v52  ;;  %4029 = vmatprep.subr.mxu1 %v7087_v48  ;;  %v152_v48 = vld [vmem:[#allocation6 + $0x338] sm:$0xff]  ;;  %v2871_v27 = vand.u32 4294901760, %v6244_v40 }
 0x157   :  { %4142 = vmatprep.subr.mxu0 %v4429_v18  ;;  %4030 = vmatpush3.msra.mxu1 %v5906_v60  ;;  %v2858_v60 = vsub.f32 %v6220_v50, %v2857_v39  ;;  %v6274_v37 = vand.u32 4294901760, %v152_v48  ;;  %v2885_v10 = vand.u32 4294901760, %v6272_v42  ;;  %v2879_v63 = vsub.f32 %v6259_v28, %v2878_v62 }
 0x158   :  { %4143 = vmatpush3.msra.mxu0 %v6187_v29  ;;  %4031 = vmatprep.subr.mxu1 %v5928_v20  ;;  %v2845_v20 = vand.u32 4294901760, %v2844_v15  ;;  %v2872_v38 = vsub.f32 %v6244_v40, %v2871_v27 }
 0x159   :  { %4144 = vmatprep.subr.mxu0 %v4429_v18  ;;  %4032 = vmatpush3.msra.mxu1 %v5938_v19  ;;  %v2852_v19 = vand.u32 4294901760, %v2851_v6  ;;  %v6294_v14 = vsub.f32 %v152_v48, %v6274_v37  ;;  %v2886_v34 = vsub.f32 %v6272_v42, %v2885_v10  ;;  %v2880_v11 = vand.u32 4294901760, %v2879_v63 }
 0x15a   :  { %4145 = vmatpush3.msra.mxu0 %v6197_v22  ;;  %4033 = vmatprep.subr.mxu1 %v5956_v47  ;;  %v6282_v47 = vsub.f32 %v153_v4, %v6261_v36  ;;  %v2873_v13 = vand.u32 4294901760, %v2872_v38  ;;  %v6343_v4 = vsub.f32 %v48_v45, %v6316_v31  ;;  %v2913_v48 = vand.u32 4294901760, %v6320_v23 }
 0x15b   :  { %4146 = vmatprep.subr.mxu0 %v4429_v18  ;;  %4034 = vmatpush3.msra.mxu1 %v5958_v56  ;;  %v2859_v56 = vand.u32 4294901760, %v2858_v60  ;;  %v2899_v43 = vand.u32 4294901760, %v6294_v14  ;;  %v2887_v15 = vand.u32 4294901760, %v2886_v34  ;;  %v145_v60 = vld [vmem:[#allocation6 + $0x300] sm:$0xff] }
 0x15c   :  { %2742 = vmatprep.mubr.f32.mxu1 %v7126_v12  ;;  %4147 = vmatpush3.msra.mxu0 %v6214_v1  ;;  %v2892_v44 = vand.u32 4294901760, %v6282_v47  ;;  %v146_v12 = vld [vmem:[#allocation6 + $0x308] sm:$0xff]  ;;  %v6366_v38 = vand.u32 4294901760, %v145_v60  ;;  %v2914_v51 = vsub.f32 %v6320_v23, %v2913_v48 }
 0x15d   :  { %2744 = vmatmul.mubr.f32.vlgmr.msra.gmra.mxu1 %v7128_v49  ;;  %4148 = vmatprep.subr.mxu0 %v4429_v18  ;;  %v6338_v49 = vsub.f32 %v149_v17, %v6314_v30  ;;  %v2900_v6 = vsub.f32 %v6294_v14, %v2899_v43 }
 0x15e   :  { %4175 = vmatprep.subr.mxu1 %v4429_v18  ;;  %4149 = vmatpush3.msra.mxu0 %v6225_v7  ;;  %v2893_v2 = vsub.f32 %v6282_v47, %v2892_v44 }
 0x15f   :  { %4176 = vmatpush3.msra.mxu1 %v2845_v20  ;;  %4150 = vmatprep.subr.mxu0 %v4429_v18  ;;  %v6355_v20 = vand.u32 4294901760, %v146_v12  ;;  %v2920_v17 = vand.u32 4294901760, %v6338_v49  ;;  %v2901_v63 = vand.u32 4294901760, %v2900_v6  ;;  %v2915_v6 = vand.u32 4294901760, %v2914_v51 }
 0x160   :  { %4177 = vmatprep.subr.mxu1 %v4429_v18  ;;  %4151 = vmatpush3.msra.mxu0 %v6236_v24  ;;  %v2894_v8 = vand.u32 4294901760, %v2893_v2 }
 0x161   :  { %4178 = vmatpush3.msra.mxu1 %v2852_v19  ;;  %4152 = vmatprep.subr.mxu0 %v4429_v18  ;;  %v3617_v19 = vadd.f32 %v3616_v0, %v3615_v41  ;;  %v6377_v41 = vsub.f32 %v146_v12, %v6355_v20  ;;  %v6385_v0 = vsub.f32 %v145_v60, %v6366_v38 }
 0x162   :  { %4179 = vmatprep.subr.mxu1 %v4429_v18  ;;  %4153 = vmatpush3.msra.mxu0 %v6249_v35  ;;  %v2921_v12 = vsub.f32 %v6338_v49, %v2920_v17 }
 0x163   :  { %4180 = vmatpush3.msra.mxu1 %v2859_v56  ;;  %4154 = vmatprep.subr.mxu0 %v4429_v18  ;;  %v6364_v56 = vsub.f32 %v147_v53, %v6340_v26  ;;  %v1022_v53 = vadd.f32 %v3617_v19, %v6192_v3  ;;  %v2948_v51 = vand.u32 4294901760, %v6385_v0 }
 0x164   :  { %4181 = vmatprep.subr.mxu1 %v4429_v18  ;;  %4155 = vmatpush3.msra.mxu0 %v6261_v36 }
 0x165   :  { %4182 = vmatpush3.msra.mxu1 %v2866_v32  ;;  %4156 = vmatprep.subr.mxu0 %v4429_v18  ;;  %v2832_v32 = vand.u32 4294901760, %v6343_v4 }
 0x166   :  { %4183 = vmatprep.subr.mxu1 %v4429_v18  ;;  %4157 = vmatpush3.msra.mxu0 %v6274_v37 }
 0x167   :  { %4184 = vmatpush3.msra.mxu1 %v2873_v13  ;;  %4158 = vmatprep.subr.mxu0 %v4429_v18  ;;  %v2927_v13 = vand.u32 4294901760, %v6353_v61  ;;  %v2833_v3 = vsub.f32 %v6343_v4, %v2832_v32 }
 0x168   :  { %4185 = vmatprep.subr.mxu1 %v4429_v18  ;;  %4159 = vmatpush3.msra.mxu0 %v6287_v57 }
 0x169   :  { %4186 = vmatpush3.msra.mxu1 %v2880_v11  ;;  %4160 = vmatprep.subr.mxu0 %v4429_v18  ;;  %v3650_v45 = vpop.f32.mrf.mxu0  ;;  %v2908_v11 = vand.u32 4294901760, %v2907_v59  ;;  %v2928_v60 = vsub.f32 %v6353_v61, %v2927_v13  ;;  %v2922_v59 = vand.u32 4294901760, %v2921_v12 }
 0x16a   :  { %4187 = vmatprep.subr.mxu1 %v4429_v18  ;;  %4161 = vmatpush3.msra.mxu0 %v6299_v54 }
 0x16b   :  { %4188 = vmatpush3.msra.mxu1 %v2887_v15  ;;  %4162 = vmatprep.subr.mxu0 %v4429_v18  ;;  %v3651_v34 = vpop.f32.mrf.mxu0  ;;  %v2934_v15 = vand.u32 4294901760, %v6364_v56 }
 0x16c   :  { %4189 = vmatprep.subr.mxu1 %v4429_v18  ;;  %4163 = vmatpush3.msra.mxu0 %v6314_v30  ;;  %v3652_v2 = vadd.f32 %v3651_v34, %v3650_v45  ;;  %v2834_v45 = vand.u32 4294901760, %v2833_v3  ;;  %v2929_v34 = vand.u32 4294901760, %v2928_v60 }
 0x16d   :  { %4190 = vmatpush3.msra.mxu1 %v2894_v8  ;;  %4164 = vmatprep.subr.mxu0 %v4429_v18  ;;  %v2941_v8 = vand.u32 4294901760, %v6377_v41 }
 0x16e   :  { %4191 = vmatprep.subr.mxu1 %v4429_v18  ;;  %4165 = vmatpush3.msra.mxu0 %v6328_v58  ;;  %v6395_v19 = vadd.f32 %v3652_v2, %v1022_v53  ;;  %v2949_v2 = vsub.f32 %v6385_v0, %v2948_v51 }
 0x16f   :  { %4192 = vmatpush3.msra.mxu1 %v2901_v63  ;;  %4166 = vmatprep.subr.mxu0 %v4429_v18  ;;  %v2935_v63 = vsub.f32 %v6364_v56, %v2934_v15  ;;  %v2942_v53 = vsub.f32 %v6377_v41, %v2941_v8 }
 0x170   :  { %4193 = vmatprep.subr.mxu1 %v4429_v18  ;;  %4167 = vmatpush3.msra.mxu0 %v6340_v26  ;;  %v2950_v3 = vand.u32 4294901760, %v2949_v2 }
 0x171   :  { %4194 = vmatpush3.msra.mxu1 %v2908_v11  ;;  %4168 = vmatprep.subr.mxu0 %v4429_v18  ;;  %v2936_v11 = vand.u32 4294901760, %v2935_v63  ;;  %v2943_v12 = vand.u32 4294901760, %v2942_v53 }
 0x172   :  { %4195 = vmatprep.subr.mxu1 %v4429_v18  ;;  %4169 = vmatpush3.msra.mxu0 %v6355_v20 }
 0x173   :  { %4196 = vmatpush3.msra.mxu1 %v2915_v6  ;;  %4170 = vmatprep.subr.mxu0 %v4429_v18  ;;  %v3685_v6 = vpop.f32.mrf.mxu1 }
 0x174   :  { %4197 = vmatprep.subr.mxu1 %v4429_v18  ;;  %4171 = vmatpush3.msra.mxu0 %v6366_v38 }
 0x175   :  { %4172 = vmatprep.mubr.msk.f32.mxu0 %vm4430_vm0, %v4429_v18  ;;  %4198 = vmatpush3.msra.mxu1 %v2922_v59  ;;  %v3686_v60 = vpop.f32.mrf.mxu1 }
 0x176   :  { %4173 = vmatmul.mubr.f32.vlgmr.msra.gmra.mxu0 %v2834_v45  ;;  %4199 = vmatprep.subr.mxu1 %v4429_v18  ;;  %v3687_v59 = vadd.f32 %v3686_v60, %v3685_v6 }
 0x177   :  { %4210 = vmatprep.subr.mxu0 %v4429_v18  ;;  %4200 = vmatpush3.msra.mxu1 %v2929_v34 }
 0x178   :  { %4211 = vmatpush3.msra.mxu0 %v6203_v21  ;;  %4201 = vmatprep.subr.mxu1 %v4429_v18  ;;  %v1366_v34 = vadd.f32 %v3687_v59, %v6395_v19 }
 0x179   :  { %4212 = vmatprep.subr.mxu0 %v4429_v18  ;;  %4202 = vmatpush3.msra.mxu1 %v2936_v11 }
 0x17a   :  { %4213 = vmatpush3.msra.mxu0 %v6209_v25  ;;  %4203 = vmatprep.subr.mxu1 %v4429_v18 }
 0x17b   :  { %4214 = vmatprep.subr.mxu0 %v4429_v18  ;;  %4204 = vmatpush3.msra.mxu1 %v2943_v12 }
 0x17c   :  { %4215 = vmatpush3.msra.mxu0 %v6220_v50  ;;  %4205 = vmatprep.subr.mxu1 %v4429_v18 }
 0x17d   :  { %4216 = vmatprep.subr.mxu0 %v4429_v18  ;;  %4206 = vmatpush3.msra.mxu1 %v2950_v3 }
 0x17e   :  { %4207 = vmatprep.mubr.msk.f32.mxu1 %vm4430_vm0, %v4429_v18  ;;  %4217 = vmatpush3.msra.mxu0 %v6234_v9 }
 0x17f   :  { %4208 = vmatmul.mubr.f32.vlgmr.msra.gmra.mxu1 %v6316_v31  ;;  %4218 = vmatprep.subr.mxu0 %v4429_v18 }
 0x180   :  { %4245 = vmatprep.subr.mxu1 %v4429_v18  ;;  %4219 = vmatpush3.msra.mxu0 %v6244_v40 }
 0x181   :  { %4246 = vmatpush3.msra.mxu1 %v6182_v52  ;;  %4220 = vmatprep.subr.mxu0 %v4429_v18 }
 0x182   :  { %4247 = vmatprep.subr.mxu1 %v4429_v18  ;;  %4221 = vmatpush3.msra.mxu0 %v6259_v28 }
 0x183   :  { %4248 = vmatpush3.msra.mxu1 %v6187_v29  ;;  %4222 = vmatprep.subr.mxu0 %v4429_v18 }
 0x184   :  { %4249 = vmatprep.subr.mxu1 %v4429_v18  ;;  %4223 = vmatpush3.msra.mxu0 %v6272_v42 }
 0x185   :  { %4250 = vmatpush3.msra.mxu1 %v6197_v22  ;;  %4224 = vmatprep.subr.mxu0 %v4429_v18 }
 0x186   :  { %4251 = vmatprep.subr.mxu1 %v4429_v18  ;;  %4225 = vmatpush3.msra.mxu0 %v6282_v47 }
 0x187   :  { %4252 = vmatpush3.msra.mxu1 %v6214_v1  ;;  %4226 = vmatprep.subr.mxu0 %v4429_v18 }
 0x188   :  { %4253 = vmatprep.subr.mxu1 %v4429_v18  ;;  %4227 = vmatpush3.msra.mxu0 %v6294_v14 }
 0x189   :  { %4254 = vmatpush3.msra.mxu1 %v6225_v7  ;;  %4228 = vmatprep.subr.mxu0 %v4429_v18 }
 0x18a   :  { %4255 = vmatprep.subr.mxu1 %v4429_v18  ;;  %4229 = vmatpush3.msra.mxu0 %v6306_v5 }
 0x18b   :  { %4256 = vmatpush3.msra.mxu1 %v6236_v24  ;;  %4230 = vmatprep.subr.mxu0 %v4429_v18  ;;  %v3720_v45 = vpop.f32.mrf.mxu0 }
 0x18c   :  { %4257 = vmatprep.subr.mxu1 %v4429_v18  ;;  %4231 = vmatpush3.msra.mxu0 %v6320_v23 }
 0x18d   :  { %4258 = vmatpush3.msra.mxu1 %v6249_v35  ;;  %4232 = vmatprep.subr.mxu0 %v4429_v18  ;;  %v3721_v63 = vpop.f32.mrf.mxu0 }
 0x18e   :  { %4259 = vmatprep.subr.mxu1 %v4429_v18  ;;  %4233 = vmatpush3.msra.mxu0 %v6338_v49  ;;  %v3722_v53 = vadd.f32 %v3721_v63, %v3720_v45 }
 0x18f   :  { %4260 = vmatpush3.msra.mxu1 %v6261_v36  ;;  %4234 = vmatprep.subr.mxu0 %v4429_v18 }
 0x190   :  { %4261 = vmatprep.subr.mxu1 %v4429_v18  ;;  %4235 = vmatpush3.msra.mxu0 %v6353_v61  ;;  %v6474_v11 = vadd.f32 %v3722_v53, %v1366_v34 }
 0x191   :  { %4262 = vmatpush3.msra.mxu1 %v6274_v37  ;;  %4236 = vmatprep.subr.mxu0 %v4429_v18 }
 0x192   :  { %4263 = vmatprep.subr.mxu1 %v4429_v18  ;;  %4237 = vmatpush3.msra.mxu0 %v6364_v56 }
 0x193   :  { %4264 = vmatpush3.msra.mxu1 %v6287_v57  ;;  %4238 = vmatprep.subr.mxu0 %v4429_v18 }
 0x194   :  { %4265 = vmatprep.subr.mxu1 %v4429_v18  ;;  %4239 = vmatpush3.msra.mxu0 %v6377_v41  ;;  %v3755_v21 = vpop.f32.mrf.mxu1 }
 0x195   :  { %4266 = vmatpush3.msra.mxu1 %v6299_v54  ;;  %4240 = vmatprep.subr.mxu0 %v4429_v18 }
 0x196   :  { %4267 = vmatprep.subr.mxu1 %v4429_v18  ;;  %4241 = vmatpush3.msra.mxu0 %v6385_v0 }
 0x197   :  { %4242 = vmatprep.mubr.msk.f32.mxu0 %vm4430_vm0, %v4429_v18  ;;  %4268 = vmatpush3.msra.mxu1 %v6314_v30 }
 0x198   :  { %4243 = vmatmul.mubr.f32.vlgmr.msra.gmra.mxu0 %v6343_v4  ;;  %4269 = vmatprep.subr.mxu1 %v4429_v18 }
 0x199   :  { %4280 = vmatprep.subr.mxu0 %v4429_v18  ;;  %4270 = vmatpush3.msra.mxu1 %v6328_v58 }
 0x19a   :  { %4281 = vmatpush3.msra.mxu0 %v2843_v16  ;;  %4271 = vmatprep.subr.mxu1 %v4429_v18 }
 0x19b   :  { %4282 = vmatprep.subr.mxu0 %v4429_v18  ;;  %4272 = vmatpush3.msra.mxu1 %v6340_v26 }
 0x19c   :  { %4283 = vmatpush3.msra.mxu0 %v2850_v46  ;;  %4273 = vmatprep.subr.mxu1 %v4429_v18 }
 0x19d   :  { %4284 = vmatprep.subr.mxu0 %v4429_v18  ;;  %4274 = vmatpush3.msra.mxu1 %v6355_v20 }
 0x19e   :  { %4285 = vmatpush3.msra.mxu0 %v2857_v39  ;;  %4275 = vmatprep.subr.mxu1 %v4429_v18 }
 0x19f   :  { %4286 = vmatprep.subr.mxu0 %v4429_v18  ;;  %4276 = vmatpush3.msra.mxu1 %v6366_v38 }
 0x1a0   :  { %4277 = vmatprep.mubr.msk.f32.mxu1 %vm4430_vm0, %v4429_v18  ;;  %4287 = vmatpush3.msra.mxu0 %v2864_v33 }
 0x1a1   :  { %4278 = vmatmul.mubr.f32.vlgmr.msra.gmra.mxu1 %v2832_v32  ;;  %4288 = vmatprep.subr.mxu0 %v4429_v18 }
 0x1a2   :  { %4315 = vmatprep.subr.mxu1 %v4429_v18  ;;  %4289 = vmatpush3.msra.mxu0 %v2871_v27 }
 0x1a3   :  { %4316 = vmatpush3.msra.mxu1 %v6182_v52  ;;  %4290 = vmatprep.subr.mxu0 %v4429_v18  ;;  %v3756_v52 = vpop.f32.mrf.mxu1 }
 0x1a4   :  { %4317 = vmatprep.subr.mxu1 %v4429_v18  ;;  %4291 = vmatpush3.msra.mxu0 %v2878_v62 }
 0x1a5   :  { %4318 = vmatpush3.msra.mxu1 %v6187_v29  ;;  %4292 = vmatprep.subr.mxu0 %v4429_v18  ;;  %v3757_v29 = vadd.f32 %v3756_v52, %v3755_v21 }
 0x1a6   :  { %4319 = vmatprep.subr.mxu1 %v4429_v18  ;;  %4293 = vmatpush3.msra.mxu0 %v2885_v10 }
 0x1a7   :  { %4320 = vmatpush3.msra.mxu1 %v6197_v22  ;;  %4294 = vmatprep.subr.mxu0 %v4429_v18 }
 0x1a8   :  { %4321 = vmatprep.subr.mxu1 %v4429_v18  ;;  %4295 = vmatpush3.msra.mxu0 %v2892_v44 }
 0x1a9   :  { %4322 = vmatpush3.msra.mxu1 %v6214_v1  ;;  %4296 = vmatprep.subr.mxu0 %v4429_v18  ;;  %v1612_v1 = vadd.f32 %v3757_v29, %v6474_v11 }
 0x1aa   :  { %4323 = vmatprep.subr.mxu1 %v4429_v18  ;;  %4297 = vmatpush3.msra.mxu0 %v2899_v43 }
 0x1ab   :  { %4324 = vmatpush3.msra.mxu1 %v6225_v7  ;;  %4298 = vmatprep.subr.mxu0 %v4429_v18 }
 0x1ac   :  { %4325 = vmatprep.subr.mxu1 %v4429_v18  ;;  %4299 = vmatpush3.msra.mxu0 %v2906_v55 }
 0x1ad   :  { %4326 = vmatpush3.msra.mxu1 %v6236_v24  ;;  %4300 = vmatprep.subr.mxu0 %v4429_v18  ;;  %v3790_v22 = vpop.f32.mrf.mxu0 }
 0x1ae   :  { %4327 = vmatprep.subr.mxu1 %v4429_v18  ;;  %4301 = vmatpush3.msra.mxu0 %v2913_v48 }
 0x1af   :  { %4328 = vmatpush3.msra.mxu1 %v6249_v35  ;;  %4302 = vmatprep.subr.mxu0 %v4429_v18  ;;  %v3791_v25 = vpop.f32.mrf.mxu0 }
 0x1b0   :  { %4329 = vmatprep.subr.mxu1 %v4429_v18  ;;  %4303 = vmatpush3.msra.mxu0 %v2920_v17  ;;  %v3792_v50 = vadd.f32 %v3791_v25, %v3790_v22 }
 0x1b1   :  { %4330 = vmatpush3.msra.mxu1 %v6261_v36  ;;  %4304 = vmatprep.subr.mxu0 %v4429_v18 }
 0x1b2   :  { %4331 = vmatprep.subr.mxu1 %v4429_v18  ;;  %4305 = vmatpush3.msra.mxu0 %v2927_v13  ;;  %v1780_v7 = vadd.f32 %v3792_v50, %v1612_v1 }
 0x1b3   :  { %4332 = vmatpush3.msra.mxu1 %v6274_v37  ;;  %4306 = vmatprep.subr.mxu0 %v4429_v18 }
 0x1b4   :  { %4333 = vmatprep.subr.mxu1 %v4429_v18  ;;  %4307 = vmatpush3.msra.mxu0 %v2934_v15 }
 0x1b5   :  { %4334 = vmatpush3.msra.mxu1 %v6287_v57  ;;  %4308 = vmatprep.subr.mxu0 %v4429_v18 }
 0x1b6   :  { %4335 = vmatprep.subr.mxu1 %v4429_v18  ;;  %4309 = vmatpush3.msra.mxu0 %v2941_v8  ;;  %v3825_v16 = vpop.f32.mrf.mxu1 }
 0x1b7   :  { %4336 = vmatpush3.msra.mxu1 %v6299_v54  ;;  %4310 = vmatprep.subr.mxu0 %v4429_v18 }
 0x1b8   :  { %4337 = vmatprep.subr.mxu1 %v4429_v18  ;;  %4311 = vmatpush3.msra.mxu0 %v2948_v51  ;;  %v3826_v46 = vpop.f32.mrf.mxu1 }
 0x1b9   :  { %4312 = vmatprep.mubr.msk.f32.mxu0 %vm4430_vm0, %v4429_v18  ;;  %4338 = vmatpush3.msra.mxu1 %v6314_v30  ;;  %v3827_v9 = vadd.f32 %v3826_v46, %v3825_v16 }
 0x1ba   :  { %4313 = vmatmul.mubr.f32.vlgmr.msra.gmra.mxu0 %v6316_v31  ;;  %4339 = vmatprep.subr.mxu1 %v4429_v18 }
 0x1bb   :  { %4347 = vmatprep.mubr.msk.f32.mxu1 %vm4430_vm0, %v4429_v18  ;;  %4340 = vmatpush3.msra.mxu1 %v6328_v58  ;;  %v1884_v40 = vadd.f32 %v3827_v9, %v1780_v7 }
 0x1bc   :  { %4341 = vmatprep.subr.mxu1 %v4429_v18 }
 0x1bd   :  { %4342 = vmatpush3.msra.mxu1 %v6340_v26 }
 0x1be   :  { %4343 = vmatprep.subr.mxu1 %v4429_v18 }
 0x1bf   :  { %4344 = vmatpush3.msra.mxu1 %v6355_v20 }
 0x1c0   :  { %4345 = vmatprep.subr.mxu1 %v4429_v18 }
 0x1c1   :  { %4346 = vmatpush3.msra.mxu1 %v6366_v38 }
 0x1c2   :  { %4348 = vmatmul.mubr.f32.vlgmr.msra.gmra.mxu1 %v6316_v31 }
 0x1d0   :  { %v3860_v24 = vpop.f32.mrf.mxu0 }
 0x1d2   :  { %v3861_v39 = vpop.f32.mrf.mxu0 }
 0x1d3   :  { %v3862_v35 = vadd.f32 %v3861_v39, %v3860_v24 }
 0x1d5   :  { %v1996_v28 = vadd.f32 %v3862_v35, %v1884_v40 }
 0x1d9   :  { %v3895_v36 = vpop.f32.mrf.mxu1 }
 0x1db   :  { %v3896_v33 = vpop.f32.mrf.mxu1 }
 0x1dc   :  { %v3897_v42 = vadd.f32 %v3896_v33, %v3895_v36 }
 0x1de   :  { %v2228_v47 = vadd.f32 %v3897_v42, %v1996_v28 }
 0x1f2   :  { %v3930_v37 = vpop.f32.mrf.mxu0 }
 0x1f4   :  { %v3931_v27 = vpop.f32.mrf.mxu0 }
 0x1f5   :  { %v3932_v57 = vadd.f32 %v3931_v27, %v3930_v37 }
 0x1f7   :  { %v2366_v18 = vadd.f32 %v3932_v57, %v2228_v47 }
 0x1fb   :  { %v3965_v62 = vpop.f32.mrf.mxu1 }
 0x1fd   :  { %v3966_v14 = vpop.f32.mrf.mxu1 }
 0x1fe   :  { %v3967_v54 = vadd.f32 %v3966_v14, %v3965_v62 }
 0x200   :  { %v2474_v44 = vadd.f32 %v3967_v54, %v2366_v18 }
 0x214   :  { %v4000_v10 = vpop.f32.mrf.mxu0 }
 0x216   :  { %v4001_v5 = vpop.f32.mrf.mxu0 }
 0x217   :  { %v4002_v30 = vadd.f32 %v4001_v5, %v4000_v10 }
 0x219   :  { %v2642_v31 = vadd.f32 %v4002_v30, %v2474_v44 }
 0x21d   :  { %v4035_v23 = vpop.f32.mrf.mxu1 }
 0x21f   :  { %v4036_v43 = vpop.f32.mrf.mxu1 }
 0x220   :  { %v4037_v58 = vadd.f32 %v4036_v43, %v4035_v23 }
 0x222   :  { %v2746_v55 = vadd.f32 %v4037_v58, %v2642_v31 }
 0x236   :  { %v2836_v49 = vpop.f32.mrf.mxu0 }
 0x237   :  { %v2837_v26 = vadd.f32 %v2836_v49, %v2746_v55 }
 0x238   :  { %v4174_v4 = vpop.f32.mrf.mxu0 }
 0x23f   :  { %v2987_v48 = vpop.f32.mrf.mxu1 }
 0x240   :  { %v2988_v41 = vadd.f32 %v2987_v48, %v2837_v26 }
 0x241   :  { %v4209_v61 = vpop.f32.mrf.mxu1 }
 0x258   :  { %v3091_v20 = vpop.f32.mrf.mxu0 }
 0x259   :  { %v3092_v0 = vadd.f32 %v3091_v20, %v2988_v41 }
 0x25a   :  { %v4244_v56 = vpop.f32.mrf.mxu0 }
 0x261   :  { %v3180_v38 = vpop.f32.mrf.mxu1 }
 0x262   :  { %v3181_v15 = vadd.f32 %v3180_v38, %v3092_v0 }
 0x263   :  { %v4279_v17 = vpop.f32.mrf.mxu1 }
 0x27a   :  { %v3299_v32 = vpop.f32.mrf.mxu0 }
 0x27b   :  { %v3300_v19 = vadd.f32 %v3299_v32, %v3181_v15 }
 0x27c   :  { %v4314_v13 = vpop.f32.mrf.mxu0 }
 0x282   :  { %v3386_v8 = vpop.f32.mrf.mxu1 }
 0x283   :  { %v3387_v51 = vadd.f32 %v3386_v8, %v3300_v19 }
 0x284   :  { %v4349_v2 = vpop.f32.mrf.mxu1 }
 0x285   :  { %4357 = vtanh.f32 %v3387_v51 }
 0x292   :  { %v4358_v12 = vpop.eup %4357 }
 0x293   :  { %3391 = vst [vmem:[#allocation8] sm:$0xff] %v4358_v12 }
 0x294   :  { %4410 = shalt.err (!%p4407_p0)
}
 0x295   :  { %3401 = dma.vmem_to_hbm [thread:$0]  %s3399_s24, 128, %s6596_s3, [#allocation5]  }
 0x296   :  { %4423 = dma.done.wait [#allocation5], 128  }
 0x297   :  { %4424 = vsyncadd [#allocation5], 4294967168 }
 0x298   :  { %3405 = vsyncpa [#allocation4], 1 }
 0x299   :  { %3406 = vsyncpa [#allocation7], 1 }
 0x29a   :  { %3407 = vsyncpa [#allocation5], 1 }

</bundles_post_ra>
